<compile_context>
chip_gen: v6e
topology: v6e:2x2x1
jax: 0.10.0
libtpu: 0.0.40
codegen_flags: <defaults>
</compile_context>

<pallas_src>
import math

import jax
import jax.numpy as jnp
from jax.experimental import pallas as pl
from jax.experimental.pallas import tpu as pltpu

KH = KW = 5  # all convs in this model are 5x5


# ----------------------------- Pallas kernels ------------------------------

def _conv_pool_kernel(q00_ref, q01_ref, q10_ref, q11_ref, w_ref, b_ref, o_ref):
    """Fused conv + bias + ReLU + 2x2 max-pool for one batch element.

    q??_ref : (K, Np) bf16  im2col patches of one pooling quadrant
    w_ref   : (Cout, K) bf16 reshaped conv weight
    b_ref   : (Cout, 1) f32  bias
    o_ref   : (Cout, Np) bf16 pooled activation, Np = Hp*Wp (lane-dense)
    """
    w = w_ref[...]

    def dotq(q_ref):
        return jnp.dot(w, q_ref[...], preferred_element_type=jnp.float32)

    # 2x2 max-pool == elementwise max over the four quadrant conv outputs;
    # bias and ReLU commute with the max, so apply them once at the end.
    m = jnp.maximum(jnp.maximum(dotq(q00_ref), dotq(q01_ref)),
                    jnp.maximum(dotq(q10_ref), dotq(q11_ref)))
    o_ref[...] = jnp.maximum(m + b_ref[...], 0.0).astype(o_ref.dtype)


def _fc_kernel(x_ref, w1_ref, b1_ref, w2_ref, b2_ref, w3_ref, b3_ref, o_ref):
    """fc1+ReLU -> fc2+ReLU -> fc3 fused into one kernel (intermediates stay
    in vregs; no narrow HBM stores for the 120/84-wide activations)."""
    h = jnp.dot(x_ref[...], w1_ref[...], preferred_element_type=jnp.float32)
    h = jnp.maximum(h + b1_ref[...], 0.0).astype(jnp.bfloat16)
    h = jnp.dot(h, w2_ref[...], preferred_element_type=jnp.float32)
    h = jnp.maximum(h + b2_ref[...], 0.0).astype(jnp.bfloat16)
    o = jnp.dot(h, w3_ref[...], preferred_element_type=jnp.float32)
    o_ref[...] = o + b3_ref[...]


_VMEM = pl.BlockSpec(memory_space=pltpu.MemorySpace.VMEM)


# ------------------------- Conv layer (glue + call) -------------------------

def conv_pool_layer(x, w2d, b2d, *, pad):
    """max_pool2d(relu(conv2d(x, w, b, 5x5, pad)), 2) in NCHW."""
    if pad:
        x = jnp.pad(x, ((0, 0), (0, 0), (pad, pad), (pad, pad)))
    B, C, H, W = x.shape
    Ho, Wo = H - KH + 1, W - KW + 1
    Hp, Wp = Ho // 2, Wo // 2
    K, Np = C * KH * KW, Hp * Wp
    Cout = w2d.shape[0]

    # TODO(synk): patch extraction still runs as XLA strided slices; generating
    # the 25 shifted slices from a VMEM-resident input tile inside the kernel
    # would remove the im2col HBM amplification entirely.
    def quadrant(dy, dx):
        cols = [x[:, :, dy + i: dy + i + 2 * Hp: 2, dx + j: dx + j + 2 * Wp: 2]
                for i in range(KH) for j in range(KW)]       # each (B,C,Hp,Wp)
        q = jnp.stack(cols, axis=2)                          # (B, C, 25, Hp, Wp)
        return q.reshape(B, K, Np)                           # K order = (c,i,j)

    quads = [quadrant(dy, dx) for dy in (0, 1) for dx in (0, 1)]

    patch_spec = pl.BlockSpec((None, K, Np), lambda b: (b, 0, 0))
    y = pl.pallas_call(
        _conv_pool_kernel,
        out_shape=jax.ShapeDtypeStruct((B, Cout, Np), jnp.bfloat16),
        grid=(B,),
        in_specs=[patch_spec, patch_spec, patch_spec, patch_spec,
                  pl.BlockSpec((Cout, K), lambda b: (0, 0)),
                  pl.BlockSpec((Cout, 1), lambda b: (0, 0))],
        out_specs=pl.BlockSpec((None, Cout, Np), lambda b: (b, 0, 0)),
        compiler_params=pltpu.CompilerParams(
            dimension_semantics=("parallel",)),
    )(*quads, w2d, b2d)
    return y.reshape(B, Cout, Hp, Wp)                        # already NCHW


def fc_head(x, p):
    B = x.shape[0]
    return pl.pallas_call(
        _fc_kernel,
        out_shape=jax.ShapeDtypeStruct((B, 2), jnp.float32),
        in_specs=[_VMEM] * 7,
        out_specs=_VMEM,
    )(x, p["fw1"], p["fb1"], p["fw2"], p["fb2"], p["fw3"], p["fb3"])


# ------------------------------ Parameters ---------------------------------

def _uniform(key, shape, fan_in):
    bound = 1.0 / math.sqrt(fan_in)
    return jax.random.uniform(key, shape, jnp.float32, -bound, bound)


def init_params(key):
    """PyTorch-shaped parameters (Conv2d / Linear default-init style)."""
    ks = jax.random.split(key, 12)
    return {
        "w1": _uniform(ks[0], (6, 3, 5, 5), 3 * 25),
        "b1": _uniform(ks[1], (6,), 3 * 25),
        "w2": _uniform(ks[2], (16, 6, 5, 5), 6 * 25),
        "b2": _uniform(ks[3], (16,), 6 * 25),
        "w3": _uniform(ks[4], (32, 16, 5, 5), 16 * 25),
        "b3": _uniform(ks[5], (32,), 16 * 25),
        "fw1": _uniform(ks[6], (120, 32 * 5 * 5), 32 * 5 * 5),
        "fb1": _uniform(ks[7], (120,), 32 * 5 * 5),
        "fw2": _uniform(ks[8], (84, 120), 120),
        "fb2": _uniform(ks[9], (84,), 120),
        "fw3": _uniform(ks[10], (2, 84), 84),
        "fb3": _uniform(ks[11], (2,), 84),
    }


def prepare_params(p):
    """One-time repack: conv W -> (Cout, K) bf16, FC W pre-transposed (K, N)
    bf16, biases f32 in broadcast-ready 2D shapes (done outside the jit)."""
    out = {}
    for i, cout in ((1, 6), (2, 16), (3, 32)):
        out[f"w{i}"] = p[f"w{i}"].reshape(cout, -1).astype(jnp.bfloat16)
        out[f"b{i}"] = p[f"b{i}"].reshape(cout, 1).astype(jnp.float32)
    for i in (1, 2, 3):
        out[f"fw{i}"] = p[f"fw{i}"].T.astype(jnp.bfloat16)
        out[f"fb{i}"] = p[f"fb{i}"].reshape(1, -1).astype(jnp.float32)
    return out


# ------------------------------- Forward -----------------------------------

@jax.jit
def cnn_forward(params, x):
    # x: (B, 3, 64, 64); 64x64 is forced by fc1 expecting 32*5*5 features.
    x = x.astype(jnp.bfloat16)
    x = conv_pool_layer(x, params["w1"], params["b1"], pad=0)   # (B, 6, 30, 30)
    x = conv_pool_layer(x, params["w2"], params["b2"], pad=1)   # (B, 16, 14, 14)
    x = conv_pool_layer(x, params["w3"], params["b3"], pad=0)   # (B, 32, 5, 5)
    x = x.reshape(x.shape[0], 32 * 5 * 5)                       # == .view(-1, 800)
    return fc_head(x, params)


if __name__ == "__main__":
    key = jax.random.PRNGKey(0)
    pkey, xkey = jax.random.split(key)
    params = prepare_params(init_params(pkey))
    x = jax.random.normal(xkey, (2, 3, 64, 64), jnp.float32)
    out = cnn_forward(params, x)
    jax.block_until_ready(out)
    assert out.shape == (2, 2), out.shape
    print("KERNEL_OK")
</pallas_src>

<mosaic_0001>
module attributes {stable_mosaic.version = 11 : i64} {
  func.func @_conv_pool_kernel(%arg0: i32, %arg1: memref<1x75x900xbf16, #tpu.memory_space<vmem>>, %arg2: memref<1x75x900xbf16, #tpu.memory_space<vmem>>, %arg3: memref<1x75x900xbf16, #tpu.memory_space<vmem>>, %arg4: memref<1x75x900xbf16, #tpu.memory_space<vmem>>, %arg5: memref<6x75xbf16, #tpu.memory_space<vmem>>, %arg6: memref<6x1xf32, #tpu.memory_space<vmem>>, %arg7: memref<1x6x900xbf16, #tpu.memory_space<vmem>>) attributes {dimension_semantics = [#tpu.dimension_semantics<parallel>], iteration_bounds = array<i64: 2>, scalar_prefetch = 0 : i64, scratch_operands = 0 : i64, tpu.core_type = #tpu.core_type<tc>, window_params = [{transform_indices = @transform_0, window_bounds = array<i64: 1, 75, 900>}, {transform_indices = @transform_1, window_bounds = array<i64: 1, 75, 900>}, {transform_indices = @transform_2, window_bounds = array<i64: 1, 75, 900>}, {transform_indices = @transform_3, window_bounds = array<i64: 1, 75, 900>}, {pipeline_mode = #tpu.pipeline_mode<synchronous>, transform_indices = @transform_4, window_bounds = array<i64: 6, 75>}, {pipeline_mode = #tpu.pipeline_mode<synchronous>, transform_indices = @transform_5, window_bounds = array<i64: 6, 1>}, {transform_indices = @transform_6, window_bounds = array<i64: 1, 6, 900>}]} {
    %c0 = arith.constant 0 : index
    %c0_0 = arith.constant 0 : index
    %0 = vector.load %arg5[%c0, %c0_0] : memref<6x75xbf16, #tpu.memory_space<vmem>>, vector<6x75xbf16>
    %c0_1 = arith.constant 0 : index
    %c0_2 = arith.constant 0 : index
    %c0_3 = arith.constant 0 : index
    %1 = vector.load %arg1[%c0_1, %c0_2, %c0_3] : memref<1x75x900xbf16, #tpu.memory_space<vmem>>, vector<1x75x900xbf16>
    %2 = vector.shape_cast %1 : vector<1x75x900xbf16> to vector<75x900xbf16>
    %cst = arith.constant dense<0.000000e+00> : vector<6x900xf32>
    %3 = tpu.matmul %0, %2, %cst {dimension_numbers = #tpu.dot_dimension_numbers<[1], [0], [0], [1], [0, 0, 1, 1], [], []>} : vector<6x75xbf16>, vector<75x900xbf16>, vector<6x900xf32> -> vector<6x900xf32>
    %c0_4 = arith.constant 0 : index
    %c0_5 = arith.constant 0 : index
    %c0_6 = arith.constant 0 : index
    %4 = vector.load %arg2[%c0_4, %c0_5, %c0_6] : memref<1x75x900xbf16, #tpu.memory_space<vmem>>, vector<1x75x900xbf16>
    %5 = vector.shape_cast %4 : vector<1x75x900xbf16> to vector<75x900xbf16>
    %cst_7 = arith.constant dense<0.000000e+00> : vector<6x900xf32>
    %6 = tpu.matmul %0, %5, %cst_7 {dimension_numbers = #tpu.dot_dimension_numbers<[1], [0], [0], [1], [0, 0, 1, 1], [], []>} : vector<6x75xbf16>, vector<75x900xbf16>, vector<6x900xf32> -> vector<6x900xf32>
    %7 = arith.maximumf %3, %6 : vector<6x900xf32>
    %c0_8 = arith.constant 0 : index
    %c0_9 = arith.constant 0 : index
    %c0_10 = arith.constant 0 : index
    %8 = vector.load %arg3[%c0_8, %c0_9, %c0_10] : memref<1x75x900xbf16, #tpu.memory_space<vmem>>, vector<1x75x900xbf16>
    %9 = vector.shape_cast %8 : vector<1x75x900xbf16> to vector<75x900xbf16>
    %cst_11 = arith.constant dense<0.000000e+00> : vector<6x900xf32>
    %10 = tpu.matmul %0, %9, %cst_11 {dimension_numbers = #tpu.dot_dimension_numbers<[1], [0], [0], [1], [0, 0, 1, 1], [], []>} : vector<6x75xbf16>, vector<75x900xbf16>, vector<6x900xf32> -> vector<6x900xf32>
    %c0_12 = arith.constant 0 : index
    %c0_13 = arith.constant 0 : index
    %c0_14 = arith.constant 0 : index
    %11 = vector.load %arg4[%c0_12, %c0_13, %c0_14] : memref<1x75x900xbf16, #tpu.memory_space<vmem>>, vector<1x75x900xbf16>
    %12 = vector.shape_cast %11 : vector<1x75x900xbf16> to vector<75x900xbf16>
    %cst_15 = arith.constant dense<0.000000e+00> : vector<6x900xf32>
    %13 = tpu.matmul %0, %12, %cst_15 {dimension_numbers = #tpu.dot_dimension_numbers<[1], [0], [0], [1], [0, 0, 1, 1], [], []>} : vector<6x75xbf16>, vector<75x900xbf16>, vector<6x900xf32> -> vector<6x900xf32>
    %14 = arith.maximumf %10, %13 : vector<6x900xf32>
    %15 = arith.maximumf %7, %14 : vector<6x900xf32>
    %c0_16 = arith.constant 0 : index
    %c0_17 = arith.constant 0 : index
    %16 = vector.load %arg6[%c0_16, %c0_17] : memref<6x1xf32, #tpu.memory_space<vmem>>, vector<6x1xf32>
    %17 = vector.broadcast %16 : vector<6x1xf32> to vector<6x900xf32>
    %18 = arith.addf %15, %17 : vector<6x900xf32>
    %cst_18 = arith.constant 0.000000e+00 : f32
    %19 = vector.broadcast %cst_18 : f32 to vector<6x900xf32>
    %20 = arith.maximumf %18, %19 : vector<6x900xf32>
    %21 = arith.truncf %20 : vector<6x900xf32> to vector<6x900xbf16>
    %c0_19 = arith.constant 0 : index
    %c0_20 = arith.constant 0 : index
    %c0_21 = arith.constant 0 : index
    %22 = vector.load %arg7[%c0_19, %c0_20, %c0_21] : memref<1x6x900xbf16, #tpu.memory_space<vmem>>, vector<1x6x900xbf16>
    %23 = vector.shape_cast %22 : vector<1x6x900xbf16> to vector<6x900xbf16>
    %24 = vector.shape_cast %21 : vector<6x900xbf16> to vector<1x6x900xbf16>
    tpu.vector_store %arg7[%c0_19, %c0_20, %c0_21], %24 {strides = array<i32>} : memref<1x6x900xbf16, #tpu.memory_space<vmem>>, vector<1x6x900xbf16>,
    return
  }
  func.func @transform_0(%arg0: i32) -> (i32, i32, i32) {
    %c0_i32 = arith.constant 0 : i32
    %c0_i32_0 = arith.constant 0 : i32
    %c0_i32_1 = arith.constant 0 : i32
    return %arg0, %c0_i32, %c0_i32_0 : i32, i32, i32
  }
  func.func @transform_1(%arg0: i32) -> (i32, i32, i32) {
    %c0_i32 = arith.constant 0 : i32
    %c0_i32_0 = arith.constant 0 : i32
    %c0_i32_1 = arith.constant 0 : i32
    return %arg0, %c0_i32, %c0_i32_0 : i32, i32, i32
  }
  func.func @transform_2(%arg0: i32) -> (i32, i32, i32) {
    %c0_i32 = arith.constant 0 : i32
    %c0_i32_0 = arith.constant 0 : i32
    %c0_i32_1 = arith.constant 0 : i32
    return %arg0, %c0_i32, %c0_i32_0 : i32, i32, i32
  }
  func.func @transform_3(%arg0: i32) -> (i32, i32, i32) {
    %c0_i32 = arith.constant 0 : i32
    %c0_i32_0 = arith.constant 0 : i32
    %c0_i32_1 = arith.constant 0 : i32
    return %arg0, %c0_i32, %c0_i32_0 : i32, i32, i32
  }
  func.func @transform_4(%arg0: i32) -> (i32, i32) {
    %c0_i32 = arith.constant 0 : i32
    %c0_i32_0 = arith.constant 0 : i32
    %c0_i32_1 = arith.constant 0 : i32
    return %c0_i32, %c0_i32_0 : i32, i32
  }
  func.func @transform_5(%arg0: i32) -> (i32, i32) {
    %c0_i32 = arith.constant 0 : i32
    %c0_i32_0 = arith.constant 0 : i32
    %c0_i32_1 = arith.constant 0 : i32
    return %c0_i32, %c0_i32_0 : i32, i32
  }
  func.func @transform_6(%arg0: i32) -> (i32, i32, i32) {
    %c0_i32 = arith.constant 0 : i32
    %c0_i32_0 = arith.constant 0 : i32
    %c0_i32_1 = arith.constant 0 : i32
    return %arg0, %c0_i32, %c0_i32_0 : i32, i32, i32
  }
}

module attributes {stable_mosaic.version = 11 : i64} {
  func.func @_conv_pool_kernel(%arg0: i32, %arg1: memref<1x150x196xbf16, #tpu.memory_space<vmem>>, %arg2: memref<1x150x196xbf16, #tpu.memory_space<vmem>>, %arg3: memref<1x150x196xbf16, #tpu.memory_space<vmem>>, %arg4: memref<1x150x196xbf16, #tpu.memory_space<vmem>>, %arg5: memref<16x150xbf16, #tpu.memory_space<vmem>>, %arg6: memref<16x1xf32, #tpu.memory_space<vmem>>, %arg7: memref<1x16x196xbf16, #tpu.memory_space<vmem>>) attributes {dimension_semantics = [#tpu.dimension_semantics<parallel>], iteration_bounds = array<i64: 2>, scalar_prefetch = 0 : i64, scratch_operands = 0 : i64, tpu.core_type = #tpu.core_type<tc>, window_params = [{transform_indices = @transform_0, window_bounds = array<i64: 1, 150, 196>}, {transform_indices = @transform_1, window_bounds = array<i64: 1, 150, 196>}, {transform_indices = @transform_2, window_bounds = array<i64: 1, 150, 196>}, {transform_indices = @transform_3, window_bounds = array<i64: 1, 150, 196>}, {pipeline_mode = #tpu.pipeline_mode<synchronous>, transform_indices = @transform_4, window_bounds = array<i64: 16, 150>}, {pipeline_mode = #tpu.pipeline_mode<synchronous>, transform_indices = @transform_5, window_bounds = array<i64: 16, 1>}, {transform_indices = @transform_6, window_bounds = array<i64: 1, 16, 196>}]} {
    %c0 = arith.constant 0 : index
    %c0_0 = arith.constant 0 : index
    %0 = vector.load %arg5[%c0, %c0_0] : memref<16x150xbf16, #tpu.memory_space<vmem>>, vector<16x150xbf16>
    %c0_1 = arith.constant 0 : index
    %c0_2 = arith.constant 0 : index
    %c0_3 = arith.constant 0 : index
    %1 = vector.load %arg1[%c0_1, %c0_2, %c0_3] : memref<1x150x196xbf16, #tpu.memory_space<vmem>>, vector<1x150x196xbf16>
    %2 = vector.shape_cast %1 : vector<1x150x196xbf16> to vector<150x196xbf16>
    %cst = arith.constant dense<0.000000e+00> : vector<16x196xf32>
    %3 = tpu.matmul %0, %2, %cst {dimension_numbers = #tpu.dot_dimension_numbers<[1], [0], [0], [1], [0, 0, 1, 1], [], []>} : vector<16x150xbf16>, vector<150x196xbf16>, vector<16x196xf32> -> vector<16x196xf32>
    %c0_4 = arith.constant 0 : index
    %c0_5 = arith.constant 0 : index
    %c0_6 = arith.constant 0 : index
    %4 = vector.load %arg2[%c0_4, %c0_5, %c0_6] : memref<1x150x196xbf16, #tpu.memory_space<vmem>>, vector<1x150x196xbf16>
    %5 = vector.shape_cast %4 : vector<1x150x196xbf16> to vector<150x196xbf16>
    %cst_7 = arith.constant dense<0.000000e+00> : vector<16x196xf32>
    %6 = tpu.matmul %0, %5, %cst_7 {dimension_numbers = #tpu.dot_dimension_numbers<[1], [0], [0], [1], [0, 0, 1, 1], [], []>} : vector<16x150xbf16>, vector<150x196xbf16>, vector<16x196xf32> -> vector<16x196xf32>
    %7 = arith.maximumf %3, %6 : vector<16x196xf32>
    %c0_8 = arith.constant 0 : index
    %c0_9 = arith.constant 0 : index
    %c0_10 = arith.constant 0 : index
    %8 = vector.load %arg3[%c0_8, %c0_9, %c0_10] : memref<1x150x196xbf16, #tpu.memory_space<vmem>>, vector<1x150x196xbf16>
    %9 = vector.shape_cast %8 : vector<1x150x196xbf16> to vector<150x196xbf16>
    %cst_11 = arith.constant dense<0.000000e+00> : vector<16x196xf32>
    %10 = tpu.matmul %0, %9, %cst_11 {dimension_numbers = #tpu.dot_dimension_numbers<[1], [0], [0], [1], [0, 0, 1, 1], [], []>} : vector<16x150xbf16>, vector<150x196xbf16>, vector<16x196xf32> -> vector<16x196xf32>
    %c0_12 = arith.constant 0 : index
    %c0_13 = arith.constant 0 : index
    %c0_14 = arith.constant 0 : index
    %11 = vector.load %arg4[%c0_12, %c0_13, %c0_14] : memref<1x150x196xbf16, #tpu.memory_space<vmem>>, vector<1x150x196xbf16>
    %12 = vector.shape_cast %11 : vector<1x150x196xbf16> to vector<150x196xbf16>
    %cst_15 = arith.constant dense<0.000000e+00> : vector<16x196xf32>
    %13 = tpu.matmul %0, %12, %cst_15 {dimension_numbers = #tpu.dot_dimension_numbers<[1], [0], [0], [1], [0, 0, 1, 1], [], []>} : vector<16x150xbf16>, vector<150x196xbf16>, vector<16x196xf32> -> vector<16x196xf32>
    %14 = arith.maximumf %10, %13 : vector<16x196xf32>
    %15 = arith.maximumf %7, %14 : vector<16x196xf32>
    %c0_16 = arith.constant 0 : index
    %c0_17 = arith.constant 0 : index
    %16 = vector.load %arg6[%c0_16, %c0_17] : memref<16x1xf32, #tpu.memory_space<vmem>>, vector<16x1xf32>
    %17 = vector.broadcast %16 : vector<16x1xf32> to vector<16x196xf32>
    %18 = arith.addf %15, %17 : vector<16x196xf32>
    %cst_18 = arith.constant 0.000000e+00 : f32
    %19 = vector.broadcast %cst_18 : f32 to vector<16x196xf32>
    %20 = arith.maximumf %18, %19 : vector<16x196xf32>
    %21 = arith.truncf %20 : vector<16x196xf32> to vector<16x196xbf16>
    %c0_19 = arith.constant 0 : index
    %c0_20 = arith.constant 0 : index
    %c0_21 = arith.constant 0 : index
    %22 = vector.load %arg7[%c0_19, %c0_20, %c0_21] : memref<1x16x196xbf16, #tpu.memory_space<vmem>>, vector<1x16x196xbf16>
    %23 = vector.shape_cast %22 : vector<1x16x196xbf16> to vector<16x196xbf16>
    %24 = vector.shape_cast %21 : vector<16x196xbf16> to vector<1x16x196xbf16>
    tpu.vector_store %arg7[%c0_19, %c0_20, %c0_21], %24 {strides = array<i32>} : memref<1x16x196xbf16, #tpu.memory_space<vmem>>, vector<1x16x196xbf16>,
    return
  }
  func.func @transform_0(%arg0: i32) -> (i32, i32, i32) {
    %c0_i32 = arith.constant 0 : i32
    %c0_i32_0 = arith.constant 0 : i32
    %c0_i32_1 = arith.constant 0 : i32
    return %arg0, %c0_i32, %c0_i32_0 : i32, i32, i32
  }
  func.func @transform_1(%arg0: i32) -> (i32, i32, i32) {
    %c0_i32 = arith.constant 0 : i32
    %c0_i32_0 = arith.constant 0 : i32
    %c0_i32_1 = arith.constant 0 : i32
    return %arg0, %c0_i32, %c0_i32_0 : i32, i32, i32
  }
  func.func @transform_2(%arg0: i32) -> (i32, i32, i32) {
    %c0_i32 = arith.constant 0 : i32
    %c0_i32_0 = arith.constant 0 : i32
    %c0_i32_1 = arith.constant 0 : i32
    return %arg0, %c0_i32, %c0_i32_0 : i32, i32, i32
  }
  func.func @transform_3(%arg0: i32) -> (i32, i32, i32) {
    %c0_i32 = arith.constant 0 : i32
    %c0_i32_0 = arith.constant 0 : i32
    %c0_i32_1 = arith.constant 0 : i32
    return %arg0, %c0_i32, %c0_i32_0 : i32, i32, i32
  }
  func.func @transform_4(%arg0: i32) -> (i32, i32) {
    %c0_i32 = arith.constant 0 : i32
    %c0_i32_0 = arith.constant 0 : i32
    %c0_i32_1 = arith.constant 0 : i32
    return %c0_i32, %c0_i32_0 : i32, i32
  }
  func.func @transform_5(%arg0: i32) -> (i32, i32) {
    %c0_i32 = arith.constant 0 : i32
    %c0_i32_0 = arith.constant 0 : i32
    %c0_i32_1 = arith.constant 0 : i32
    return %c0_i32, %c0_i32_0 : i32, i32
  }
  func.func @transform_6(%arg0: i32) -> (i32, i32, i32) {
    %c0_i32 = arith.constant 0 : i32
    %c0_i32_0 = arith.constant 0 : i32
    %c0_i32_1 = arith.constant 0 : i32
    return %arg0, %c0_i32, %c0_i32_0 : i32, i32, i32
  }
}

module attributes {stable_mosaic.version = 11 : i64} {
  func.func @_conv_pool_kernel(%arg0: i32, %arg1: memref<1x400x25xbf16, #tpu.memory_space<vmem>>, %arg2: memref<1x400x25xbf16, #tpu.memory_space<vmem>>, %arg3: memref<1x400x25xbf16, #tpu.memory_space<vmem>>, %arg4: memref<1x400x25xbf16, #tpu.memory_space<vmem>>, %arg5: memref<32x400xbf16, #tpu.memory_space<vmem>>, %arg6: memref<32x1xf32, #tpu.memory_space<vmem>>, %arg7: memref<1x32x25xbf16, #tpu.memory_space<vmem>>) attributes {dimension_semantics = [#tpu.dimension_semantics<parallel>], iteration_bounds = array<i64: 2>, scalar_prefetch = 0 : i64, scratch_operands = 0 : i64, tpu.core_type = #tpu.core_type<tc>, window_params = [{transform_indices = @transform_0, window_bounds = array<i64: 1, 400, 25>}, {transform_indices = @transform_1, window_bounds = array<i64: 1, 400, 25>}, {transform_indices = @transform_2, window_bounds = array<i64: 1, 400, 25>}, {transform_indices = @transform_3, window_bounds = array<i64: 1, 400, 25>}, {pipeline_mode = #tpu.pipeline_mode<synchronous>, transform_indices = @transform_4, window_bounds = array<i64: 32, 400>}, {pipeline_mode = #tpu.pipeline_mode<synchronous>, transform_indices = @transform_5, window_bounds = array<i64: 32, 1>}, {transform_indices = @transform_6, window_bounds = array<i64: 1, 32, 25>}]} {
    %c0 = arith.constant 0 : index
    %c0_0 = arith.constant 0 : index
    %0 = vector.load %arg5[%c0, %c0_0] : memref<32x400xbf16, #tpu.memory_space<vmem>>, vector<32x400xbf16>
    %c0_1 = arith.constant 0 : index
    %c0_2 = arith.constant 0 : index
    %c0_3 = arith.constant 0 : index
    %1 = vector.load %arg1[%c0_1, %c0_2, %c0_3] : memref<1x400x25xbf16, #tpu.memory_space<vmem>>, vector<1x400x25xbf16>
    %2 = vector.shape_cast %1 : vector<1x400x25xbf16> to vector<400x25xbf16>
    %cst = arith.constant dense<0.000000e+00> : vector<32x25xf32>
    %3 = tpu.matmul %0, %2, %cst {dimension_numbers = #tpu.dot_dimension_numbers<[1], [0], [0], [1], [0, 0, 1, 1], [], []>} : vector<32x400xbf16>, vector<400x25xbf16>, vector<32x25xf32> -> vector<32x25xf32>
    %c0_4 = arith.constant 0 : index
    %c0_5 = arith.constant 0 : index
    %c0_6 = arith.constant 0 : index
    %4 = vector.load %arg2[%c0_4, %c0_5, %c0_6] : memref<1x400x25xbf16, #tpu.memory_space<vmem>>, vector<1x400x25xbf16>
    %5 = vector.shape_cast %4 : vector<1x400x25xbf16> to vector<400x25xbf16>
    %cst_7 = arith.constant dense<0.000000e+00> : vector<32x25xf32>
    %6 = tpu.matmul %0, %5, %cst_7 {dimension_numbers = #tpu.dot_dimension_numbers<[1], [0], [0], [1], [0, 0, 1, 1], [], []>} : vector<32x400xbf16>, vector<400x25xbf16>, vector<32x25xf32> -> vector<32x25xf32>
    %7 = arith.maximumf %3, %6 : vector<32x25xf32>
    %c0_8 = arith.constant 0 : index
    %c0_9 = arith.constant 0 : index
    %c0_10 = arith.constant 0 : index
    %8 = vector.load %arg3[%c0_8, %c0_9, %c0_10] : memref<1x400x25xbf16, #tpu.memory_space<vmem>>, vector<1x400x25xbf16>
    %9 = vector.shape_cast %8 : vector<1x400x25xbf16> to vector<400x25xbf16>
    %cst_11 = arith.constant dense<0.000000e+00> : vector<32x25xf32>
    %10 = tpu.matmul %0, %9, %cst_11 {dimension_numbers = #tpu.dot_dimension_numbers<[1], [0], [0], [1], [0, 0, 1, 1], [], []>} : vector<32x400xbf16>, vector<400x25xbf16>, vector<32x25xf32> -> vector<32x25xf32>
    %c0_12 = arith.constant 0 : index
    %c0_13 = arith.constant 0 : index
    %c0_14 = arith.constant 0 : index
    %11 = vector.load %arg4[%c0_12, %c0_13, %c0_14] : memref<1x400x25xbf16, #tpu.memory_space<vmem>>, vector<1x400x25xbf16>
    %12 = vector.shape_cast %11 : vector<1x400x25xbf16> to vector<400x25xbf16>
    %cst_15 = arith.constant dense<0.000000e+00> : vector<32x25xf32>
    %13 = tpu.matmul %0, %12, %cst_15 {dimension_numbers = #tpu.dot_dimension_numbers<[1], [0], [0], [1], [0, 0, 1, 1], [], []>} : vector<32x400xbf16>, vector<400x25xbf16>, vector<32x25xf32> -> vector<32x25xf32>
    %14 = arith.maximumf %10, %13 : vector<32x25xf32>
    %15 = arith.maximumf %7, %14 : vector<32x25xf32>
    %c0_16 = arith.constant 0 : index
    %c0_17 = arith.constant 0 : index
    %16 = vector.load %arg6[%c0_16, %c0_17] : memref<32x1xf32, #tpu.memory_space<vmem>>, vector<32x1xf32>
    %17 = vector.broadcast %16 : vector<32x1xf32> to vector<32x25xf32>
    %18 = arith.addf %15, %17 : vector<32x25xf32>
    %cst_18 = arith.constant 0.000000e+00 : f32
    %19 = vector.broadcast %cst_18 : f32 to vector<32x25xf32>
    %20 = arith.maximumf %18, %19 : vector<32x25xf32>
    %21 = arith.truncf %20 : vector<32x25xf32> to vector<32x25xbf16>
    %c0_19 = arith.constant 0 : index
    %c0_20 = arith.constant 0 : index
    %c0_21 = arith.constant 0 : index
    %22 = vector.load %arg7[%c0_19, %c0_20, %c0_21] : memref<1x32x25xbf16, #tpu.memory_space<vmem>>, vector<1x32x25xbf16>
    %23 = vector.shape_cast %22 : vector<1x32x25xbf16> to vector<32x25xbf16>
    %24 = vector.shape_cast %21 : vector<32x25xbf16> to vector<1x32x25xbf16>
    tpu.vector_store %arg7[%c0_19, %c0_20, %c0_21], %24 {strides = array<i32>} : memref<1x32x25xbf16, #tpu.memory_space<vmem>>, vector<1x32x25xbf16>,
    return
  }
  func.func @transform_0(%arg0: i32) -> (i32, i32, i32) {
    %c0_i32 = arith.constant 0 : i32
    %c0_i32_0 = arith.constant 0 : i32
    %c0_i32_1 = arith.constant 0 : i32
    return %arg0, %c0_i32, %c0_i32_0 : i32, i32, i32
  }
  func.func @transform_1(%arg0: i32) -> (i32, i32, i32) {
    %c0_i32 = arith.constant 0 : i32
    %c0_i32_0 = arith.constant 0 : i32
    %c0_i32_1 = arith.constant 0 : i32
    return %arg0, %c0_i32, %c0_i32_0 : i32, i32, i32
  }
  func.func @transform_2(%arg0: i32) -> (i32, i32, i32) {
    %c0_i32 = arith.constant 0 : i32
    %c0_i32_0 = arith.constant 0 : i32
    %c0_i32_1 = arith.constant 0 : i32
    return %arg0, %c0_i32, %c0_i32_0 : i32, i32, i32
  }
  func.func @transform_3(%arg0: i32) -> (i32, i32, i32) {
    %c0_i32 = arith.constant 0 : i32
    %c0_i32_0 = arith.constant 0 : i32
    %c0_i32_1 = arith.constant 0 : i32
    return %arg0, %c0_i32, %c0_i32_0 : i32, i32, i32
  }
  func.func @transform_4(%arg0: i32) -> (i32, i32) {
    %c0_i32 = arith.constant 0 : i32
    %c0_i32_0 = arith.constant 0 : i32
    %c0_i32_1 = arith.constant 0 : i32
    return %c0_i32, %c0_i32_0 : i32, i32
  }
  func.func @transform_5(%arg0: i32) -> (i32, i32) {
    %c0_i32 = arith.constant 0 : i32
    %c0_i32_0 = arith.constant 0 : i32
    %c0_i32_1 = arith.constant 0 : i32
    return %c0_i32, %c0_i32_0 : i32, i32
  }
  func.func @transform_6(%arg0: i32) -> (i32, i32, i32) {
    %c0_i32 = arith.constant 0 : i32
    %c0_i32_0 = arith.constant 0 : i32
    %c0_i32_1 = arith.constant 0 : i32
    return %arg0, %c0_i32, %c0_i32_0 : i32, i32, i32
  }
}

module attributes {stable_mosaic.version = 11 : i64} {
  func.func @_fc_kernel(%arg0: memref<2x800xbf16, #tpu.memory_space<vmem>>, %arg1: memref<800x120xbf16, #tpu.memory_space<vmem>>, %arg2: memref<1x120xf32, #tpu.memory_space<vmem>>, %arg3: memref<120x84xbf16, #tpu.memory_space<vmem>>, %arg4: memref<1x84xf32, #tpu.memory_space<vmem>>, %arg5: memref<84x2xbf16, #tpu.memory_space<vmem>>, %arg6: memref<1x2xf32, #tpu.memory_space<vmem>>, %arg7: memref<2x2xf32, #tpu.memory_space<vmem>>) attributes {dimension_semantics = [], scalar_prefetch = 0 : i64, scratch_operands = 0 : i64, tpu.core_type = #tpu.core_type<tc>} {
    %c0 = arith.constant 0 : index
    %c0_0 = arith.constant 0 : index
    %0 = vector.load %arg0[%c0, %c0_0] : memref<2x800xbf16, #tpu.memory_space<vmem>>, vector<2x800xbf16>
    %c0_1 = arith.constant 0 : index
    %c0_2 = arith.constant 0 : index
    %1 = vector.load %arg1[%c0_1, %c0_2] : memref<800x120xbf16, #tpu.memory_space<vmem>>, vector<800x120xbf16>
    %cst = arith.constant dense<0.000000e+00> : vector<2x120xf32>
    %2 = tpu.matmul %0, %1, %cst {dimension_numbers = #tpu.dot_dimension_numbers<[1], [0], [0], [1], [0, 0, 1, 1], [], []>} : vector<2x800xbf16>, vector<800x120xbf16>, vector<2x120xf32> -> vector<2x120xf32>
    %c0_3 = arith.constant 0 : index
    %c0_4 = arith.constant 0 : index
    %3 = vector.load %arg2[%c0_3, %c0_4] : memref<1x120xf32, #tpu.memory_space<vmem>>, vector<1x120xf32>
    %4 = vector.broadcast %3 : vector<1x120xf32> to vector<2x120xf32>
    %5 = arith.addf %2, %4 : vector<2x120xf32>
    %cst_5 = arith.constant 0.000000e+00 : f32
    %6 = vector.broadcast %cst_5 : f32 to vector<2x120xf32>
    %7 = arith.maximumf %5, %6 : vector<2x120xf32>
    %8 = arith.truncf %7 : vector<2x120xf32> to vector<2x120xbf16>
    %c0_6 = arith.constant 0 : index
    %c0_7 = arith.constant 0 : index
    %9 = vector.load %arg3[%c0_6, %c0_7] : memref<120x84xbf16, #tpu.memory_space<vmem>>, vector<120x84xbf16>
    %cst_8 = arith.constant dense<0.000000e+00> : vector<2x84xf32>
    %10 = tpu.matmul %8, %9, %cst_8 {dimension_numbers = #tpu.dot_dimension_numbers<[1], [0], [0], [1], [0, 0, 1, 1], [], []>} : vector<2x120xbf16>, vector<120x84xbf16>, vector<2x84xf32> -> vector<2x84xf32>
    %c0_9 = arith.constant 0 : index
    %c0_10 = arith.constant 0 : index
    %11 = vector.load %arg4[%c0_9, %c0_10] : memref<1x84xf32, #tpu.memory_space<vmem>>, vector<1x84xf32>
    %12 = vector.broadcast %11 : vector<1x84xf32> to vector<2x84xf32>
    %13 = arith.addf %10, %12 : vector<2x84xf32>
    %cst_11 = arith.constant 0.000000e+00 : f32
    %14 = vector.broadcast %cst_11 : f32 to vector<2x84xf32>
    %15 = arith.maximumf %13, %14 : vector<2x84xf32>
    %16 = arith.truncf %15 : vector<2x84xf32> to vector<2x84xbf16>
    %c0_12 = arith.constant 0 : index
    %c0_13 = arith.constant 0 : index
    %17 = vector.load %arg5[%c0_12, %c0_13] : memref<84x2xbf16, #tpu.memory_space<vmem>>, vector<84x2xbf16>
    %cst_14 = arith.constant dense<0.000000e+00> : vector<2x2xf32>
    %18 = tpu.matmul %16, %17, %cst_14 {dimension_numbers = #tpu.dot_dimension_numbers<[1], [0], [0], [1], [0, 0, 1, 1], [], []>} : vector<2x84xbf16>, vector<84x2xbf16>, vector<2x2xf32> -> vector<2x2xf32>
    %c0_15 = arith.constant 0 : index
    %c0_16 = arith.constant 0 : index
    %19 = vector.load %arg6[%c0_15, %c0_16] : memref<1x2xf32, #tpu.memory_space<vmem>>, vector<1x2xf32>
    %20 = vector.broadcast %19 : vector<1x2xf32> to vector<2x2xf32>
    %21 = arith.addf %18, %20 : vector<2x2xf32>
    %c0_17 = arith.constant 0 : index
    %c0_18 = arith.constant 0 : index
    %22 = vector.load %arg7[%c0_17, %c0_18] : memref<2x2xf32, #tpu.memory_space<vmem>>, vector<2x2xf32>
    tpu.vector_store %arg7[%c0_17, %c0_18], %21 {strides = array<i32>} : memref<2x2xf32, #tpu.memory_space<vmem>>, vector<2x2xf32>,
    return
  }
}

</mosaic_0001>

<bundles_post_ra>
// kernel: cnn_forward.4
= control target key start
LH: loop header
LB: loop body
LE: loop exit
PB: predicated region body
PF: predicated region fallthrough
CT: control target
= control target key end

     0   :  { %s2433_s21 = smov 0   ;;  %s2830_s0 = inlined_call_operand.vmem [shape: bf16[2,75,900], index: 0, kind: input, shape index: {}]   ;;  %s2831_s1 = inlined_call_operand.vmem [shape: bf16[2,75,900], index: 1, kind: input, shape index: {}]   ;;  %s2832_s2 = inlined_call_operand.vmem [shape: bf16[2,75,900], index: 2, kind: input, shape index: {}]   ;;  %s2833_s3 = inlined_call_operand.vmem [shape: bf16[2,75,900], index: 3, kind: input, shape index: {}]   ;;  %s2834_s4 = inlined_call_operand.vmem [shape: bf16[6,75], index: 4, kind: input, shape index: {}]   ;;  %s2835_s5 = inlined_call_operand.vmem [shape: f32[6,1], index: 5, kind: input, shape index: {}]   ;;  %s2836_s6 = inlined_call_operand.vmem [shape: bf16[2,6,900], index: 6, kind: output, shape index: {}]  }
   0x1 LB: > { %s2178_s22 = sadd.s32 4294967295, %s2394_s21   ;;  %p2182_p0 = scmp.ge.s32.totalorder %s2394_s21, 1  ;;  %s2394_s21 = sphi %s2433_s21, %s16_s21  }
   0x2   : > { %p242_p1 = scmp.lt.s32.totalorder %s2394_s21, 3 }
   0x4   : > { %p243_p2 = pnand %p2182_p0, %p242_p1 }
   0x5   : > { %p287_p3 = scmp.lt.s32.totalorder (!%p243_p2), %s2178_s22, 1 }
   0x6   : > { %246 = sbr.rel (%p243_p2) target bundleno = 387 (0x183), region = 44 }
   0xb   : > { %vm550_vm0 = vcmask 1044480   ;;  %v2396_v0 = vmov 0   ;;  %s2838_s22 = smov (!%p287_p3, %s2178_s22), 1  ;;  %vm551_vm1 = vcmask 1045504   ;;  %v2397_v1 = vmov 65535  }
   0xc   : > { %610 = vmatprep.mubr.bf16.mxu0 %v2396_v0  ;;  %651 = vmatprep.mubr.bf16.mxu1 %v2396_v0  ;;  %s2447_s23 = smul.u32 320, %s2838_s22  ;;  %v552_v2 = vsel %vm550_vm0, 4294967295, %v2397_v1  ;;  %v2494_v62 = vld [vmem:[%s2834_s4] sm:$0x7]  ;;  %vm546_vm2 = vcmask 613376   ;;  %s2371_s16 = sshll.u32 %s2838_s22, 5 }
   0xd   : > { %2387 = vset.pattern.permute.xlu0 %v2396_v0  ;;  %v2457_v5 = vsel %vm551_vm1, %v552_v2, 0  ;;  %s2809_s19 = scalar_lea.vmem %s2836_s6, %s2371_s16  ;;  %vm2083_vm3 = vcmask 1042432   ;;  %vm2084_vm4 = vcmask 30724  }
   0xe   : > { %s2453_s26 = scalar_lea.vmem %s2830_s0, %s2447_s23  ;;  %s2502_s7 = scalar_lea.vmem %s2832_s2, %s2447_s23  ;;  %vm2085_vm5 = vmor %vm2084_vm4, %vm2083_vm3 }
   0xf   : > { %v346_v3 = vld [vmem:[%s2453_s26 + $0x100] sm:$0xff]  ;;  %v347_v6 = vld [vmem:[%s2453_s26 + $0x108] sm:$0xff]  ;;  %v348_v41 = vld [vmem:[%s2453_s26 + $0x110] sm:$0xff]  ;;  %s2523_s10 = scalar_lea.vmem %s2831_s1, %s2447_s23  ;;  %s2568_s13 = scalar_lea.vmem %s2833_s3, %s2447_s23 }
  0x10   : > { %v350_v4 = vld [vmem:[%s2453_s26 + $0x120] sm:$0x33]  ;;  %v351_v8 = vld [vmem:[%s2453_s26 + $0x128] sm:$0x33]  ;;  %v352_v42 = vld [vmem:[%s2453_s26 + $0x130] sm:$0x33] }
  0x11   : > { %v2222_v7 = vcombine.high %v346_v3, %v350_v4  ;;  %v2221_v9 = vcombine.low %v346_v3, %v350_v4  ;;  %v338_v10 = vld [vmem:[%s2453_s26 + $0xc0] sm:$0xff]  ;;  %v2224_v12 = vcombine.high %v347_v6, %v351_v8  ;;  %v2223_v13 = vcombine.low %v347_v6, %v351_v8  ;;  %v339_v14 = vld [vmem:[%s2453_s26 + $0xc8] sm:$0xff]  ;;  %v349_v44 = vld [vmem:[%s2453_s26 + $0x118] sm:$0xff] }
  0x12   : > { %v342_v11 = vld [vmem:[%s2453_s26 + $0xe0] sm:$0xff]  ;;  %v343_v15 = vld [vmem:[%s2453_s26 + $0xe8] sm:$0xff]  ;;  %v353_v45 = vld [vmem:[%s2453_s26 + $0x138] sm:$0x33]  ;;  %v2226_v49 = vcombine.high %v348_v41, %v352_v42  ;;  %v2225_v53 = vcombine.low %v348_v41, %v352_v42 }
  0x13   : > { %v558_v16 = vand.u32 %v2222_v7, %v2457_v5  ;;  %v555_v17 = vand.u32 %v2221_v9, %v2457_v5  ;;  %v2214_v18 = vcombine.high %v338_v10, %v342_v11  ;;  %v564_v19 = vand.u32 %v2224_v12, %v2457_v5  ;;  %v330_v22 = vld [vmem:[%s2453_s26 + $0x80] sm:$0xff]  ;;  %v331_v24 = vld [vmem:[%s2453_s26 + $0x88] sm:$0xff]  ;;  %v340_v58 = vld [vmem:[%s2453_s26 + $0xd0] sm:$0xff] }
  0x14   : > { %v561_v20 = vand.u32 %v2223_v13, %v2457_v5  ;;  %v2216_v21 = vcombine.high %v339_v14, %v343_v15  ;;  %v334_v23 = vld [vmem:[%s2453_s26 + $0xa0] sm:$0xff]  ;;  %v335_v25 = vld [vmem:[%s2453_s26 + $0xa8] sm:$0xff]  ;;  %v2213_v26 = vcombine.low %v338_v10, %v342_v11  ;;  %v2215_v27 = vcombine.low %v339_v14, %v343_v15  ;;  %v344_v59 = vld [vmem:[%s2453_s26 + $0xf0] sm:$0xff] }
  0x15   : > { %584 = vmatprep.subr.bf16.mxu0 %v558_v16  ;;  %625 = vmatprep.subr.bf16.mxu1 %v564_v19  ;;  %v2206_v28 = vcombine.high %v330_v22, %v334_v23  ;;  %v2208_v29 = vcombine.high %v331_v24, %v335_v25  ;;  %v322_v30 = vld [vmem:[%s2453_s26 + $0x40] sm:$0xff]  ;;  %v323_v32 = vld [vmem:[%s2453_s26 + $0x48] sm:$0xff]  ;;  %v2205_v34 = vcombine.low %v330_v22, %v334_v23  ;;  %v341_v60 = vld [vmem:[%s2453_s26 + $0xd8] sm:$0xff] }
  0x16   : > { %585 = vmatpush1.bf16.msra.mxu0 %v555_v17  ;;  %626 = vmatpush1.bf16.msra.mxu1 %v561_v20  ;;  %v326_v31 = vld [vmem:[%s2453_s26 + $0x60] sm:$0xff]  ;;  %v327_v33 = vld [vmem:[%s2453_s26 + $0x68] sm:$0xff]  ;;  %v2207_v35 = vcombine.low %v331_v24, %v335_v25  ;;  %v2228_v51 = vcombine.high %v349_v44, %v353_v45  ;;  %v570_v55 = vand.u32 %v2226_v49, %v2457_v5  ;;  %v345_v61 = vld [vmem:[%s2453_s26 + $0xf8] sm:$0xff] }
  0x17   : > { %586 = vmatprep.subr.bf16.mxu0 %v2214_v18  ;;  %627 = vmatprep.subr.bf16.mxu1 %v2216_v21  ;;  %v2198_v36 = vcombine.high %v322_v30, %v326_v31  ;;  %v314_v37 = vld [vmem:[%s2453_s26] sm:$0xff]  ;;  %v2200_v39 = vcombine.high %v323_v32, %v327_v33  ;;  %v315_v40 = vld [vmem:[%s2453_s26 + $0x8] sm:$0xff]  ;;  %v2197_v46 = vcombine.low %v322_v30, %v326_v31  ;;  %v332_v4 = vld [vmem:[%s2453_s26 + $0x90] sm:$0xff] }
  0x18   : > { %v318_v38 = vld [vmem:[%s2453_s26 + $0x20] sm:$0xff]  ;;  %v319_v43 = vld [vmem:[%s2453_s26 + $0x28] sm:$0xff]  ;;  %v2199_v47 = vcombine.low %v323_v32, %v327_v33  ;;  %v2227_v56 = vcombine.low %v349_v44, %v353_v45  ;;  %v576_v57 = vand.u32 %v2228_v51, %v2457_v5  ;;  %v567_v63 = vand.u32 %v2225_v53, %v2457_v5  ;;  %v336_v6 = vld [vmem:[%s2453_s26 + $0xb0] sm:$0xff] }
  0x19   : > { %v2190_v48 = vcombine.high %v314_v37, %v318_v38  ;;  %v2192_v50 = vcombine.high %v315_v40, %v319_v43  ;;  %v2189_v52 = vcombine.low %v314_v37, %v318_v38  ;;  %v2191_v54 = vcombine.low %v315_v40, %v319_v43  ;;  %v333_v7 = vld [vmem:[%s2453_s26 + $0x98] sm:$0xff]  ;;  %v1202_v10 = vld [vmem:[%s2502_s7 + $0x100] sm:$0xff]  ;;  %v1203_v14 = vld [vmem:[%s2502_s7 + $0x108] sm:$0xff] }
  0x1a   : > { %587 = vmatpush1.bf16.msra.mxu0 %v2213_v26  ;;  %628 = vmatpush1.bf16.msra.mxu1 %v2215_v27  ;;  %v573_v1 = vand.u32 %v2227_v56, %v2457_v5  ;;  %v2218_v2 = vcombine.high %v340_v58, %v344_v59  ;;  %v2220_v3 = vcombine.high %v341_v60, %v345_v61  ;;  %v337_v8 = vld [vmem:[%s2453_s26 + $0xb8] sm:$0xff]  ;;  %v1206_v13 = vld [vmem:[%s2502_s7 + $0x120] sm:$0x33]  ;;  %v1207_v15 = vld [vmem:[%s2502_s7 + $0x128] sm:$0x33] }
  0x1b   : > { %588 = vmatprep.subr.bf16.mxu0 %v2206_v28  ;;  %629 = vmatprep.subr.bf16.mxu1 %v2208_v29  ;;  %v2217_v9 = vcombine.low %v340_v58, %v344_v59  ;;  %v2219_v11 = vcombine.low %v341_v60, %v345_v61  ;;  %v2210_v12 = vcombine.high %v332_v4, %v336_v6  ;;  %v324_v17 = vld [vmem:[%s2453_s26 + $0x50] sm:$0xff]  ;;  %v325_v21 = vld [vmem:[%s2453_s26 + $0x58] sm:$0xff]  ;;  %v774_v32 = vld [vmem:[%s2523_s10 + $0x100] sm:$0xff] }
  0x1c   : > { %v2212_v16 = vcombine.high %v333_v7, %v337_v8  ;;  %v328_v18 = vld [vmem:[%s2453_s26 + $0x70] sm:$0xff]  ;;  %v2309_v19 = vcombine.low %v1202_v10, %v1206_v13  ;;  %v2310_v20 = vcombine.high %v1202_v10, %v1206_v13  ;;  %v329_v22 = vld [vmem:[%s2453_s26 + $0x78] sm:$0xff]  ;;  %v2311_v23 = vcombine.low %v1203_v14, %v1207_v15  ;;  %v778_v33 = vld [vmem:[%s2523_s10 + $0x120] sm:$0x33] }
  0x1d   : > { %v2312_v24 = vcombine.high %v1203_v14, %v1207_v15  ;;  %v2209_v25 = vcombine.low %v332_v4, %v336_v6  ;;  %v2211_v26 = vcombine.low %v333_v7, %v337_v8  ;;  %v316_v27 = vld [vmem:[%s2453_s26 + $0x10] sm:$0xff]  ;;  %v2202_v30 = vcombine.high %v324_v17, %v328_v18  ;;  %v317_v37 = vld [vmem:[%s2453_s26 + $0x18] sm:$0xff]  ;;  %v779_v41 = vld [vmem:[%s2523_s10 + $0x128] sm:$0x33] }
  0x1e   : > { %589 = vmatpush1.bf16.msra.mxu0 %v2205_v34  ;;  %630 = vmatpush1.bf16.msra.mxu1 %v2207_v35  ;;  %v2530_v28 = vand.u32 %v2310_v20, %v2457_v5  ;;  %v2533_v29 = vand.u32 %v2309_v19, %v2457_v5  ;;  %v320_v31 = vld [vmem:[%s2453_s26 + $0x30] sm:$0xff]  ;;  %v2542_v35 = vand.u32 %v2311_v23, %v2457_v5  ;;  %v321_v38 = vld [vmem:[%s2453_s26 + $0x38] sm:$0xff]  ;;  %v1622_v6 = vld [vmem:[%s2568_s13 + $0x100] sm:$0xff] }
  0x1f   : > { %590 = vmatprep.subr.bf16.mxu0 %v2198_v36  ;;  %631 = vmatprep.subr.bf16.mxu1 %v2200_v39  ;;  %v2539_v34 = vand.u32 %v2312_v24, %v2457_v5  ;;  %v2204_v36 = vcombine.high %v325_v21, %v329_v22  ;;  %v775_v39 = vld [vmem:[%s2523_s10 + $0x108] sm:$0xff]  ;;  %v2201_v40 = vcombine.low %v324_v17, %v328_v18  ;;  %v1204_v42 = vld [vmem:[%s2502_s7 + $0x110] sm:$0xff]  ;;  %v1209_v49 = vld [vmem:[%s2502_s7 + $0x138] sm:$0x33] }
  0x20   : > { %v1208_v43 = vld [vmem:[%s2502_s7 + $0x130] sm:$0x33]  ;;  %v2203_v44 = vcombine.low %v325_v21, %v329_v22  ;;  %v2194_v45 = vcombine.high %v316_v27, %v320_v31  ;;  %v2196_v53 = vcombine.high %v317_v37, %v321_v38  ;;  %v2193_v59 = vcombine.low %v316_v27, %v320_v31  ;;  %v1626_v7 = vld [vmem:[%s2568_s13 + $0x120] sm:$0x33]  ;;  %v1623_v8 = vld [vmem:[%s2568_s13 + $0x108] sm:$0xff] }
  0x21   : > { %v2265_v60 = vcombine.low %v774_v32, %v778_v33  ;;  %v2195_v61 = vcombine.low %v317_v37, %v321_v38  ;;  %v771_v10 = vld [vmem:[%s2523_s10 + $0xe8] sm:$0xff]  ;;  %v758_v22 = vld [vmem:[%s2523_s10 + $0x80] sm:$0xff]  ;;  %v1624_v31 = vld [vmem:[%s2568_s13 + $0x110] sm:$0xff] }
  0x22   : > { %591 = vmatpush1.bf16.msra.mxu0 %v2197_v46  ;;  %632 = vmatpush1.bf16.msra.mxu1 %v2199_v47  ;;  %v2266_v46 = vcombine.high %v774_v32, %v778_v33  ;;  %v2313_v47 = vcombine.low %v1204_v42, %v1208_v43  ;;  %v1627_v13 = vld [vmem:[%s2568_s13 + $0x128] sm:$0x33]  ;;  %v762_v23 = vld [vmem:[%s2523_s10 + $0xa0] sm:$0xff]  ;;  %v1625_v37 = vld [vmem:[%s2568_s13 + $0x118] sm:$0xff] }
  0x23   : > { %592 = vmatprep.subr.bf16.mxu0 %v2190_v48  ;;  %633 = vmatprep.subr.bf16.mxu1 %v2192_v50  ;;  %v1205_v48 = vld [vmem:[%s2502_s7 + $0x118] sm:$0xff]  ;;  %v2314_v50 = vcombine.high %v1204_v42, %v1208_v43  ;;  %v975_v14 = vand.u32 %v2265_v60, %v2457_v5  ;;  %v2356_v17 = vcombine.high %v1623_v8, %v1627_v13  ;;  %v763_v27 = vld [vmem:[%s2523_s10 + $0xa8] sm:$0xff] }
  0x24   : > { %v2315_v51 = vcombine.low %v1205_v48, %v1209_v49  ;;  %v2250_v33 = vcombine.high %v758_v22, %v762_v23  ;;  %v1629_v38 = vld [vmem:[%s2568_s13 + $0x138] sm:$0x33] }
  0x25   : > { %v2556_v56 = vand.u32 %v2314_v50, %v2457_v5  ;;  %v2591_v24 = vand.u32 %v2356_v17, %v2457_v5 }
  0x26   : > { %593 = vmatpush1.bf16.msra.mxu0 %v2189_v52  ;;  %634 = vmatpush1.bf16.msra.mxu1 %v2191_v54  ;;  %v2316_v52 = vcombine.high %v1205_v48, %v1209_v49  ;;  %v2268_v54 = vcombine.high %v775_v39, %v779_v41  ;;  %v2562_v58 = vand.u32 %v2315_v51, %v2457_v5 }
  0x27   : > { %666 = vmatprep.subr.bf16.mxu0 %v570_v55  ;;  %707 = vmatprep.subr.bf16.mxu1 %v576_v57  ;;  %v2553_v55 = vand.u32 %v2313_v47, %v2457_v5  ;;  %v2360_v47 = vcombine.high %v1625_v37, %v1629_v38  ;;  %v2249_v48 = vcombine.low %v758_v22, %v762_v23  ;;  %v772_v22 = vld [vmem:[%s2523_s10 + $0xf0] sm:$0xff]  ;;  %v769_v23 = vld [vmem:[%s2523_s10 + $0xd8] sm:$0xff] }
  0x28   : > { %v2559_v57 = vand.u32 %v2316_v52, %v2457_v5  ;;  %v984_v4 = vand.u32 %v2268_v54, %v2457_v5  ;;  %v746_v54 = vld [vmem:[%s2523_s10 + $0x20] sm:$0xff] }
  0x29   : > { %2229 = vmatmul.mubr.msk.bf16.vlgmr.msra.gmra.mxu0 %vm546_vm2, %v2494_v62  ;;  %2230 = vmatmul.mubr.msk.bf16.vlgmr.msra.gmra.mxu1 %vm546_vm2, %v2494_v62 }
  0x2a   : > { %667 = vmatpush1.bf16.msra.mxu0 %v567_v63  ;;  %708 = vmatpush1.bf16.msra.mxu1 %v573_v1  ;;  %v978_v63 = vand.u32 %v2266_v46, %v2457_v5  ;;  %v2267_v1 = vcombine.low %v775_v39, %v779_v41  ;;  %v754_v41 = vld [vmem:[%s2523_s10 + $0x60] sm:$0xff]  ;;  %v2359_v46 = vcombine.low %v1625_v37, %v1629_v38  ;;  %v761_v37 = vld [vmem:[%s2523_s10 + $0x98] sm:$0xff] }
  0x2b   : > { %668 = vmatprep.subr.bf16.mxu0 %v2218_v2  ;;  %709 = vmatprep.subr.bf16.mxu1 %v2220_v3  ;;  %v766_v2 = vld [vmem:[%s2523_s10 + $0xc0] sm:$0xff]  ;;  %v765_v38 = vld [vmem:[%s2523_s10 + $0xb8] sm:$0xff] }
  0x2c   : > { %692 = vmatprep.mubr.bf16.mxu0 %v2396_v0  ;;  %733 = vmatprep.mubr.bf16.mxu1 %v2396_v0  ;;  %v770_v3 = vld [vmem:[%s2523_s10 + $0xe0] sm:$0xff]  ;;  %v981_v18 = vand.u32 %v2267_v1, %v2457_v5  ;;  %v2624_v60 = vand.u32 %v2359_v46, %v2457_v5  ;;  %v776_v1 = vld [vmem:[%s2523_s10 + $0x110] sm:$0xff] }
  0x2d   : > { %v2258_v15 = vcombine.high %v766_v2, %v770_v3 }
  0x2e   : > { %669 = vmatpush1.bf16.msra.mxu0 %v2217_v9  ;;  %710 = vmatpush1.bf16.msra.mxu1 %v2219_v11  ;;  %v767_v9 = vld [vmem:[%s2523_s10 + $0xc8] sm:$0xff]  ;;  %v2353_v11 = vcombine.low %v1622_v6, %v1626_v7 }
  0x2f   : > { %670 = vmatprep.subr.bf16.mxu0 %v2210_v12  ;;  %711 = vmatprep.subr.bf16.mxu1 %v2212_v16  ;;  %v2354_v12 = vcombine.high %v1622_v6, %v1626_v7  ;;  %v2355_v16 = vcombine.low %v1623_v8, %v1627_v13  ;;  %v2260_v21 = vcombine.high %v767_v9, %v771_v10  ;;  %v781_v6 = vld [vmem:[%s2523_s10 + $0x138] sm:$0x33] }
  0x30   : > { %v2586_v20 = vand.u32 %v2353_v11, %v2457_v5  ;;  %v2259_v32 = vcombine.low %v767_v9, %v771_v10 }
  0x31   : > { %v2583_v19 = vand.u32 %v2354_v12, %v2457_v5 }
  0x32   : > { %671 = vmatpush1.bf16.msra.mxu0 %v2209_v25  ;;  %712 = vmatpush1.bf16.msra.mxu1 %v2211_v26  ;;  %v2594_v25 = vand.u32 %v2355_v16, %v2457_v5  ;;  %v759_v26 = vld [vmem:[%s2523_s10 + $0x88] sm:$0xff] }
  0x33   : > { %672 = vmatprep.subr.bf16.mxu0 %v2202_v30  ;;  %713 = vmatprep.subr.bf16.mxu1 %v2204_v36  ;;  %v2257_v30 = vcombine.low %v766_v2, %v770_v3  ;;  %v1628_v36 = vld [vmem:[%s2568_s13 + $0x130] sm:$0x33]  ;;  %v2252_v39 = vcombine.high %v759_v26, %v763_v27  ;;  %v2251_v49 = vcombine.low %v759_v26, %v763_v27  ;;  %v747_v3 = vld [vmem:[%s2523_s10 + $0x28] sm:$0xff]  ;;  %v773_v26 = vld [vmem:[%s2523_s10 + $0xf8] sm:$0xff] }
  0x34   : > { %v2357_v42 = vcombine.low %v1624_v31, %v1628_v36  ;;  %v2358_v43 = vcombine.high %v1624_v31, %v1628_v36  ;;  %v780_v2 = vld [vmem:[%s2523_s10 + $0x130] sm:$0x33] }
  0x35   : > { %v2270_v10 = vcombine.high %v776_v1, %v780_v2  ;;  %v764_v36 = vld [vmem:[%s2523_s10 + $0xb0] sm:$0xff] }
  0x36   : > { %673 = vmatpush1.bf16.msra.mxu0 %v2201_v40  ;;  %714 = vmatpush1.bf16.msra.mxu1 %v2203_v44  ;;  %v750_v40 = vld [vmem:[%s2523_s10 + $0x40] sm:$0xff]  ;;  %v751_v44 = vld [vmem:[%s2523_s10 + $0x48] sm:$0xff]  ;;  %v2613_v50 = vand.u32 %v2358_v43, %v2457_v5  ;;  %v2616_v51 = vand.u32 %v2357_v42, %v2457_v5  ;;  %v752_v42 = vld [vmem:[%s2523_s10 + $0x50] sm:$0xff] }
  0x37   : > { %674 = vmatprep.subr.bf16.mxu0 %v2194_v45  ;;  %715 = vmatprep.subr.bf16.mxu1 %v2196_v53  ;;  %v755_v45 = vld [vmem:[%s2523_s10 + $0x68] sm:$0xff]  ;;  %v2242_v52 = vcombine.high %v750_v40, %v754_v41  ;;  %v742_v53 = vld [vmem:[%s2523_s10] sm:$0xff]  ;;  %v2241_v7 = vcombine.low %v750_v40, %v754_v41  ;;  %v990_v16 = vand.u32 %v2270_v10, %v2457_v5  ;;  %v756_v43 = vld [vmem:[%s2523_s10 + $0x70] sm:$0xff] }
  0x38   : > { %v2243_v8 = vcombine.low %v751_v44, %v755_v45  ;;  %v2234_v9 = vcombine.high %v742_v53, %v746_v54  ;;  %v2233_v13 = vcombine.low %v742_v53, %v746_v54  ;;  %v2256_v41 = vcombine.high %v761_v37, %v765_v38  ;;  %v748_v53 = vld [vmem:[%s2523_s10 + $0x30] sm:$0xff]  ;;  %v745_v54 = vld [vmem:[%s2523_s10 + $0x18] sm:$0xff]  ;;  %v1199_v10 = vld [vmem:[%s2502_s7 + $0xe8] sm:$0xff] }
  0x3a   : > { %675 = vmatpush1.bf16.msra.mxu0 %v2193_v59  ;;  %716 = vmatpush1.bf16.msra.mxu1 %v2195_v61  ;;  %v2621_v59 = vand.u32 %v2360_v47, %v2457_v5  ;;  %v2244_v61 = vcombine.high %v751_v44, %v755_v45  ;;  %v753_v44 = vld [vmem:[%s2523_s10 + $0x58] sm:$0xff]  ;;  %v2255_v47 = vcombine.low %v761_v37, %v765_v38  ;;  %v1175_v37 = vld [vmem:[%s2502_s7 + $0x28] sm:$0xff] }
  0x3b   : > { %1004 = vmatprep.subr.bf16.mxu0 %v978_v63  ;;  %1045 = vmatprep.subr.bf16.mxu1 %v984_v4  ;;  %v743_v63 = vld [vmem:[%s2523_s10 + $0x8] sm:$0xff]  ;;  %v777_v4 = vld [vmem:[%s2523_s10 + $0x118] sm:$0xff] }
  0x3c   : > { %v2236_v11 = vcombine.high %v743_v63, %v747_v3  ;;  %v2272_v12 = vcombine.high %v777_v4, %v781_v6  ;;  %v2271_v17 = vcombine.low %v777_v4, %v781_v6  ;;  %v757_v45 = vld [vmem:[%s2523_s10 + $0x78] sm:$0xff] }
  0x3d   : > { %2231 = vmatmul.mubr.msk.bf16.vlgmr.msra.gmra.mxu0 %vm546_vm2, %v2494_v62  ;;  %2232 = vmatmul.mubr.msk.bf16.vlgmr.msra.gmra.mxu1 %vm546_vm2, %v2494_v62 }
  0x3e   : > { %1005 = vmatpush1.bf16.msra.mxu0 %v975_v14  ;;  %1046 = vmatpush1.bf16.msra.mxu1 %v981_v18  ;;  %v2269_v14 = vcombine.low %v776_v1, %v780_v2  ;;  %v996_v18 = vand.u32 %v2272_v12, %v2457_v5  ;;  %v2247_v1 = vcombine.low %v753_v44, %v757_v45 }
  0x3f   : > { %1006 = vmatprep.subr.bf16.mxu0 %v2258_v15  ;;  %1047 = vmatprep.subr.bf16.mxu1 %v2260_v21  ;;  %v2235_v15 = vcombine.low %v743_v63, %v747_v3  ;;  %v768_v21 = vld [vmem:[%s2523_s10 + $0xd0] sm:$0xff]  ;;  %v2245_v63 = vcombine.low %v752_v42, %v756_v43 }
  0x40   : > { %1030 = vmatprep.mubr.bf16.mxu0 %v2396_v0  ;;  %1071 = vmatprep.mubr.bf16.mxu1 %v2396_v0  ;;  %v987_v27 = vand.u32 %v2269_v14, %v2457_v5  ;;  %v2262_v31 = vcombine.high %v768_v21, %v772_v22  ;;  %v1190_v14 = vld [vmem:[%s2502_s7 + $0xa0] sm:$0xff] }
  0x42   : > { %1007 = vmatpush1.bf16.msra.mxu0 %v2257_v30  ;;  %1048 = vmatpush1.bf16.msra.mxu1 %v2259_v32  ;;  %v993_v30 = vand.u32 %v2271_v17, %v2457_v5  ;;  %v2264_v32 = vcombine.high %v769_v23, %v773_v26  ;;  %v2263_v5 = vcombine.low %v769_v23, %v773_v26  ;;  %v1179_v23 = vld [vmem:[%s2502_s7 + $0x48] sm:$0xff] }
  0x43   : > { %1008 = vmatprep.subr.bf16.mxu0 %v2250_v33  ;;  %1049 = vmatprep.subr.bf16.mxu1 %v2252_v39  ;;  %v760_v33 = vld [vmem:[%s2523_s10 + $0x90] sm:$0xff]  ;;  %v2261_v39 = vcombine.low %v768_v21, %v772_v22  ;;  %v1178_v21 = vld [vmem:[%s2502_s7 + $0x40] sm:$0xff]  ;;  %v1183_v26 = vld [vmem:[%s2502_s7 + $0x68] sm:$0xff] }
  0x44   : > { %v2254_v40 = vcombine.high %v760_v33, %v764_v36  ;;  %v2253_v46 = vcombine.low %v760_v33, %v764_v36  ;;  %v1182_v22 = vld [vmem:[%s2502_s7 + $0x60] sm:$0xff]  ;;  %v1171_v36 = vld [vmem:[%s2502_s7 + $0x8] sm:$0xff] }
  0x45   : > { %v1174_v33 = vld [vmem:[%s2502_s7 + $0x20] sm:$0xff]  ;;  %v2285_v38 = vcombine.low %v1178_v21, %v1182_v22 }
  0x46   : > { %1009 = vmatpush1.bf16.msra.mxu0 %v2249_v48  ;;  %1050 = vmatpush1.bf16.msra.mxu1 %v2251_v49  ;;  %v2246_v48 = vcombine.high %v752_v42, %v756_v43  ;;  %v2248_v49 = vcombine.high %v753_v44, %v757_v45  ;;  %v2279_v42 = vcombine.low %v1171_v36, %v1175_v37  ;;  %v1196_v43 = vld [vmem:[%s2502_s7 + $0xd0] sm:$0xff]  ;;  %v1197_v45 = vld [vmem:[%s2502_s7 + $0xd8] sm:$0xff] }
  0x47   : > { %1010 = vmatprep.subr.bf16.mxu0 %v2242_v52  ;;  %1051 = vmatprep.subr.bf16.mxu1 %v2244_v61  ;;  %v744_v52 = vld [vmem:[%s2523_s10 + $0x10] sm:$0xff]  ;;  %v749_v61 = vld [vmem:[%s2523_s10 + $0x38] sm:$0xff] }
  0x48   : > { %v2238_v2 = vcombine.high %v744_v52, %v748_v53  ;;  %v2240_v3 = vcombine.high %v745_v54, %v749_v61  ;;  %v2237_v4 = vcombine.low %v744_v52, %v748_v53  ;;  %v2239_v6 = vcombine.low %v745_v54, %v749_v61  ;;  %v1200_v44 = vld [vmem:[%s2502_s7 + $0xf0] sm:$0xff]  ;;  %v1189_v53 = vld [vmem:[%s2502_s7 + $0x98] sm:$0xff] }
  0x49   : > { %v1192_v52 = vld [vmem:[%s2502_s7 + $0xb0] sm:$0xff]  ;;  %v1193_v54 = vld [vmem:[%s2502_s7 + $0xb8] sm:$0xff] }
  0x4a   : > { %1011 = vmatpush1.bf16.msra.mxu0 %v2241_v7  ;;  %1052 = vmatpush1.bf16.msra.mxu1 %v2243_v8  ;;  %v1194_v7 = vld [vmem:[%s2502_s7 + $0xc0] sm:$0xff] }
  0x4b   : > { %1012 = vmatprep.subr.bf16.mxu0 %v2234_v9  ;;  %1053 = vmatprep.subr.bf16.mxu1 %v2236_v11  ;;  %v1198_v8 = vld [vmem:[%s2502_s7 + $0xe0] sm:$0xff]  ;;  %v1195_v9 = vld [vmem:[%s2502_s7 + $0xc8] sm:$0xff] }
  0x4c   : > { %v2302_v11 = vcombine.high %v1194_v7, %v1198_v8  ;;  %v2304_v12 = vcombine.high %v1195_v9, %v1199_v10 }
  0x4e   : > { %1013 = vmatpush1.bf16.msra.mxu0 %v2233_v13  ;;  %1054 = vmatpush1.bf16.msra.mxu1 %v2235_v15  ;;  %v1186_v13 = vld [vmem:[%s2502_s7 + $0x80] sm:$0xff]  ;;  %v1187_v15 = vld [vmem:[%s2502_s7 + $0x88] sm:$0xff] }
  0x4f   : > { %1086 = vmatprep.subr.bf16.mxu0 %v990_v16  ;;  %1127 = vmatprep.subr.bf16.mxu1 %v996_v18  ;;  %v1191_v16 = vld [vmem:[%s2502_s7 + $0xa8] sm:$0xff]  ;;  %v2294_v17 = vcombine.high %v1186_v13, %v1190_v14 }
  0x50   : > { %v2296_v18 = vcombine.high %v1187_v15, %v1191_v16 }
  0x51   : > { %2273 = vmatmul.mubr.msk.bf16.vlgmr.msra.gmra.mxu0 %vm546_vm2, %v2494_v62  ;;  %2274 = vmatmul.mubr.msk.bf16.vlgmr.msra.gmra.mxu1 %vm546_vm2, %v2494_v62 }
  0x52   : > { %1087 = vmatpush1.bf16.msra.mxu0 %v987_v27  ;;  %1128 = vmatpush1.bf16.msra.mxu1 %v993_v30  ;;  %v2295_v27 = vcombine.low %v1187_v15, %v1191_v16  ;;  %v2286_v30 = vcombine.high %v1178_v21, %v1182_v22  ;;  %v1619_v21 = vld [vmem:[%s2568_s13 + $0xe8] sm:$0xff] }
  0x53   : > { %1088 = vmatprep.subr.bf16.mxu0 %v2262_v31  ;;  %1129 = vmatprep.subr.bf16.mxu1 %v2264_v32  ;;  %v2288_v31 = vcombine.high %v1179_v23, %v1183_v26  ;;  %v1170_v32 = vld [vmem:[%s2502_s7] sm:$0xff] }
  0x54   : > { %1112 = vmatprep.mubr.bf16.mxu0 %v2396_v0  ;;  %1153 = vmatprep.mubr.bf16.mxu1 %v2396_v0 }
  0x56   : > { %1089 = vmatpush1.bf16.msra.mxu0 %v2261_v39  ;;  %1130 = vmatpush1.bf16.msra.mxu1 %v2263_v5  ;;  %v2287_v39 = vcombine.low %v1179_v23, %v1183_v26  ;;  %v2278_v5 = vcombine.high %v1170_v32, %v1174_v33  ;;  %v1606_v26 = vld [vmem:[%s2568_s13 + $0x80] sm:$0xff] }
  0x57   : > { %1090 = vmatprep.subr.bf16.mxu0 %v2254_v40  ;;  %1131 = vmatprep.subr.bf16.mxu1 %v2256_v41  ;;  %v2280_v40 = vcombine.high %v1171_v36, %v1175_v37  ;;  %v2277_v41 = vcombine.low %v1170_v32, %v1174_v33  ;;  %v1598_v32 = vld [vmem:[%s2568_s13 + $0x40] sm:$0xff]  ;;  %v1599_v36 = vld [vmem:[%s2568_s13 + $0x48] sm:$0xff] }
  0x58   : > { %v1602_v33 = vld [vmem:[%s2568_s13 + $0x60] sm:$0xff]  ;;  %v1603_v37 = vld [vmem:[%s2568_s13 + $0x68] sm:$0xff] }
  0x5a   : > { %1091 = vmatpush1.bf16.msra.mxu0 %v2253_v46  ;;  %1132 = vmatpush1.bf16.msra.mxu1 %v2255_v47  ;;  %v1201_v46 = vld [vmem:[%s2502_s7 + $0xf8] sm:$0xff]  ;;  %v2306_v47 = vcombine.high %v1196_v43, %v1200_v44 }
  0x5b   : > { %1092 = vmatprep.subr.bf16.mxu0 %v2246_v48  ;;  %1133 = vmatprep.subr.bf16.mxu1 %v2248_v49  ;;  %v2308_v48 = vcombine.high %v1197_v45, %v1201_v46  ;;  %v1188_v49 = vld [vmem:[%s2502_s7 + $0x90] sm:$0xff] }
  0x5c   : > { %v2298_v61 = vcombine.high %v1188_v49, %v1192_v52 }
  0x5e   : > { %1093 = vmatpush1.bf16.msra.mxu0 %v2245_v63  ;;  %1134 = vmatpush1.bf16.msra.mxu1 %v2247_v1  ;;  %v2300_v63 = vcombine.high %v1189_v53, %v1193_v54  ;;  %v1180_v1 = vld [vmem:[%s2502_s7 + $0x50] sm:$0xff] }
  0x5f   : > { %1094 = vmatprep.subr.bf16.mxu0 %v2238_v2  ;;  %1135 = vmatprep.subr.bf16.mxu1 %v2240_v3  ;;  %v1184_v2 = vld [vmem:[%s2502_s7 + $0x70] sm:$0xff]  ;;  %v1181_v3 = vld [vmem:[%s2502_s7 + $0x58] sm:$0xff] }
  0x62   : > { %1095 = vmatpush1.bf16.msra.mxu0 %v2237_v4  ;;  %1136 = vmatpush1.bf16.msra.mxu1 %v2239_v6  ;;  %v1185_v4 = vld [vmem:[%s2502_s7 + $0x78] sm:$0xff]  ;;  %v2290_v6 = vcombine.high %v1180_v1, %v1184_v2 }
  0x63   : > { %1432 = vmatprep.subr.bf16.mxu0 %v2530_v28  ;;  %1473 = vmatprep.subr.bf16.mxu1 %v2539_v34  ;;  %v2301_v28 = vcombine.low %v1194_v7, %v1198_v8  ;;  %v2303_v34 = vcombine.low %v1195_v9, %v1199_v10  ;;  %v2292_v7 = vcombine.high %v1181_v3, %v1185_v4  ;;  %v1172_v8 = vld [vmem:[%s2502_s7 + $0x10] sm:$0xff]  ;;  %v1173_v10 = vld [vmem:[%s2502_s7 + $0x18] sm:$0xff] }
  0x64   : > { %v1176_v9 = vld [vmem:[%s2502_s7 + $0x30] sm:$0xff] }
  0x65   : > { %2275 = vmatmul.mubr.msk.bf16.vlgmr.msra.gmra.mxu0 %vm546_vm2, %v2494_v62  ;;  %2276 = vmatmul.mubr.msk.bf16.vlgmr.msra.gmra.mxu1 %vm546_vm2, %v2494_v62  ;;  %v2281_v16 = vcombine.low %v1172_v8, %v1176_v9 }
  0x66   : > { %1433 = vmatpush1.bf16.msra.mxu0 %v2533_v29  ;;  %1474 = vmatpush1.bf16.msra.mxu1 %v2542_v35  ;;  %v2293_v29 = vcombine.low %v1186_v13, %v1190_v14  ;;  %v2026_v35 = vld [vmem:[%s2835_s5] sm:$0x3f]  ;;  %v2291_v13 = vcombine.low %v1181_v3, %v1185_v4  ;;  %v2282_v14 = vcombine.high %v1172_v8, %v1176_v9 }
  0x67   : > { %1434 = vmatprep.subr.bf16.mxu0 %v2302_v11  ;;  %1475 = vmatprep.subr.bf16.mxu1 %v2304_v12  ;;  %v1177_v11 = vld [vmem:[%s2502_s7 + $0x38] sm:$0xff]  ;;  %v2289_v12 = vcombine.low %v1180_v1, %v1184_v2 }
  0x68   : > { %1458 = vmatprep.mubr.bf16.mxu0 %v2396_v0  ;;  %1499 = vmatprep.mubr.bf16.mxu1 %v2396_v0  ;;  %v2284_v15 = vcombine.high %v1173_v10, %v1177_v11  ;;  %v1609_v1 = vld [vmem:[%s2568_s13 + $0x98] sm:$0xff] }
  0x69   : > { %2029 = vperm.xlu0 %2387, %v2026_v35   ;;  %v1607_v35 = vld [vmem:[%s2568_s13 + $0x88] sm:$0xff]  ;;  %v1613_v2 = vld [vmem:[%s2568_s13 + $0xb8] sm:$0xff] }
  0x6a   : > { %1435 = vmatpush1.bf16.msra.mxu0 %v2301_v28  ;;  %1476 = vmatpush1.bf16.msra.mxu1 %v2303_v34  ;;  %v2283_v28 = vcombine.low %v1173_v10, %v1177_v11  ;;  %v1614_v34 = vld [vmem:[%s2568_s13 + $0xc0] sm:$0xff]  ;;  %v2344_v4 = vcombine.high %v1609_v1, %v1613_v2  ;;  %v1592_v10 = vld [vmem:[%s2568_s13 + $0x10] sm:$0xff] }
  0x6b   : > { %1436 = vmatprep.subr.bf16.mxu0 %v2294_v17  ;;  %1477 = vmatprep.subr.bf16.mxu1 %v2296_v18  ;;  %v1618_v17 = vld [vmem:[%s2568_s13 + $0xe0] sm:$0xff]  ;;  %v1615_v18 = vld [vmem:[%s2568_s13 + $0xc8] sm:$0xff]  ;;  %v1596_v11 = vld [vmem:[%s2568_s13 + $0x30] sm:$0xff] }
  0x6c   : > { %v2346_v22 = vcombine.high %v1614_v34, %v1618_v17  ;;  %v2348_v23 = vcombine.high %v1615_v18, %v1619_v21 }
  0x6e   : > { %1437 = vmatpush1.bf16.msra.mxu0 %v2293_v29  ;;  %1478 = vmatpush1.bf16.msra.mxu1 %v2295_v27  ;;  %v1610_v29 = vld [vmem:[%s2568_s13 + $0xa0] sm:$0xff]  ;;  %v1611_v27 = vld [vmem:[%s2568_s13 + $0xa8] sm:$0xff] }
  0x6f   : > { %1438 = vmatprep.subr.bf16.mxu0 %v2286_v30  ;;  %1479 = vmatprep.subr.bf16.mxu1 %v2288_v31  ;;  %v2338_v30 = vcombine.high %v1606_v26, %v1610_v29  ;;  %v2340_v31 = vcombine.high %v1607_v35, %v1611_v27 }
  0x72   : > { %1439 = vmatpush1.bf16.msra.mxu0 %v2285_v38  ;;  %1480 = vmatpush1.bf16.msra.mxu1 %v2287_v39  ;;  %v2330_v38 = vcombine.high %v1598_v32, %v1602_v33  ;;  %v2332_v39 = vcombine.high %v1599_v36, %v1603_v37 }
  0x73   : > { %1440 = vmatprep.subr.bf16.mxu0 %v2278_v5  ;;  %1481 = vmatprep.subr.bf16.mxu1 %v2280_v40  ;;  %v1590_v5 = vld [vmem:[%s2568_s13] sm:$0xff] }
  0x74   : > { %v1594_v40 = vld [vmem:[%s2568_s13 + $0x20] sm:$0xff] }
  0x76   : > { %1441 = vmatpush1.bf16.msra.mxu0 %v2277_v41  ;;  %1482 = vmatpush1.bf16.msra.mxu1 %v2279_v42  ;;  %v1591_v41 = vld [vmem:[%s2568_s13 + $0x8] sm:$0xff] }
  0x77   : > { %1514 = vmatprep.subr.bf16.mxu0 %v2556_v56  ;;  %1555 = vmatprep.subr.bf16.mxu1 %v2559_v57  ;;  %v2305_v56 = vcombine.low %v1196_v43, %v1200_v44  ;;  %v2307_v57 = vcombine.low %v1197_v45, %v1201_v46  ;;  %v1595_v42 = vld [vmem:[%s2568_s13 + $0x28] sm:$0xff]  ;;  %v2329_v43 = vcombine.low %v1598_v32, %v1602_v33 }
  0x78   : > { %v2331_v44 = vcombine.low %v1599_v36, %v1603_v37  ;;  %v2322_v45 = vcombine.high %v1590_v5, %v1594_v40  ;;  %v2324_v46 = vcombine.high %v1591_v41, %v1595_v42 }
  0x79   : > { %2317 = vmatmul.mubr.msk.bf16.vlgmr.msra.gmra.mxu0 %vm546_vm2, %v2494_v62  ;;  %2318 = vmatmul.mubr.msk.bf16.vlgmr.msra.gmra.mxu1 %vm546_vm2, %v2494_v62 }
  0x7a   : > { %1515 = vmatpush1.bf16.msra.mxu0 %v2553_v55  ;;  %1556 = vmatpush1.bf16.msra.mxu1 %v2562_v58  ;;  %v2297_v55 = vcombine.low %v1188_v49, %v1192_v52  ;;  %v2299_v58 = vcombine.low %v1189_v53, %v1193_v54  ;;  %v1616_v49 = vld [vmem:[%s2568_s13 + $0xd0] sm:$0xff]  ;;  %v1617_v53 = vld [vmem:[%s2568_s13 + $0xd8] sm:$0xff] }
  0x7b   : > { %1516 = vmatprep.subr.bf16.mxu0 %v2306_v47  ;;  %1557 = vmatprep.subr.bf16.mxu1 %v2308_v48  ;;  %v2321_v47 = vcombine.low %v1590_v5, %v1594_v40  ;;  %v2323_v48 = vcombine.low %v1591_v41, %v1595_v42  ;;  %v1620_v52 = vld [vmem:[%s2568_s13 + $0xf0] sm:$0xff]  ;;  %v1621_v54 = vld [vmem:[%s2568_s13 + $0xf8] sm:$0xff] }
  0x7c   : > { %1540 = vmatprep.mubr.bf16.mxu0 %v2396_v0  ;;  %1581 = vmatprep.mubr.bf16.mxu1 %v2396_v0 }
  0x7e   : > { %1517 = vmatpush1.bf16.msra.mxu0 %v2305_v56  ;;  %1558 = vmatpush1.bf16.msra.mxu1 %v2307_v57  ;;  %v2350_v56 = vcombine.high %v1616_v49, %v1620_v52  ;;  %v2352_v57 = vcombine.high %v1617_v53, %v1621_v54 }
  0x7f   : > { %1518 = vmatprep.subr.bf16.mxu0 %v2298_v61  ;;  %1559 = vmatprep.subr.bf16.mxu1 %v2300_v63  ;;  %v1608_v61 = vld [vmem:[%s2568_s13 + $0x90] sm:$0xff] }
  0x80   : > { %v1612_v63 = vld [vmem:[%s2568_s13 + $0xb0] sm:$0xff] }
  0x81   : > { %v2342_v3 = vcombine.high %v1608_v61, %v1612_v63 }
  0x82   : > { %1519 = vmatpush1.bf16.msra.mxu0 %v2297_v55  ;;  %1560 = vmatpush1.bf16.msra.mxu1 %v2299_v58  ;;  %v1600_v55 = vld [vmem:[%s2568_s13 + $0x50] sm:$0xff] }
  0x83   : > { %1520 = vmatprep.subr.bf16.mxu0 %v2290_v6  ;;  %1561 = vmatprep.subr.bf16.mxu1 %v2292_v7  ;;  %v1604_v58 = vld [vmem:[%s2568_s13 + $0x70] sm:$0xff]  ;;  %v1601_v6 = vld [vmem:[%s2568_s13 + $0x58] sm:$0xff] }
  0x84   : > { %v1605_v7 = vld [vmem:[%s2568_s13 + $0x78] sm:$0xff]  ;;  %v2334_v8 = vcombine.high %v1600_v55, %v1604_v58 }
  0x85   : > { %v2336_v9 = vcombine.high %v1601_v6, %v1605_v7 }
  0x86   : > { %1521 = vmatpush1.bf16.msra.mxu0 %v2289_v12  ;;  %1562 = vmatpush1.bf16.msra.mxu1 %v2291_v13  ;;  %v1593_v12 = vld [vmem:[%s2568_s13 + $0x18] sm:$0xff] }
  0x87   : > { %1522 = vmatprep.subr.bf16.mxu0 %v2282_v14  ;;  %1563 = vmatprep.subr.bf16.mxu1 %v2284_v15  ;;  %v1597_v13 = vld [vmem:[%s2568_s13 + $0x38] sm:$0xff]  ;;  %v2333_v14 = vcombine.low %v1600_v55, %v1604_v58  ;;  %v2335_v15 = vcombine.low %v1601_v6, %v1605_v7 }
  0x8a   : > { %1523 = vmatpush1.bf16.msra.mxu0 %v2281_v16  ;;  %1564 = vmatpush1.bf16.msra.mxu1 %v2283_v28  ;;  %v2326_v16 = vcombine.high %v1592_v10, %v1596_v11  ;;  %v2325_v28 = vcombine.low %v1592_v10, %v1596_v11 }
  0x8b   : > { %1852 = vmatprep.subr.bf16.mxu0 %v2583_v19  ;;  %1893 = vmatprep.subr.bf16.mxu1 %v2591_v24  ;;  %v2345_v19 = vcombine.low %v1614_v34, %v1618_v17  ;;  %v2347_v24 = vcombine.low %v1615_v18, %v1619_v21  ;;  %v2327_v34 = vcombine.low %v1593_v12, %v1597_v13 }
  0x8d   : > { %2319 = vmatmul.mubr.msk.bf16.vlgmr.msra.gmra.mxu0 %vm546_vm2, %v2494_v62  ;;  %2320 = vmatmul.mubr.msk.bf16.vlgmr.msra.gmra.mxu1 %vm546_vm2, %v2494_v62 }
  0x8e   : > { %1853 = vmatpush1.bf16.msra.mxu0 %v2586_v20  ;;  %1894 = vmatpush1.bf16.msra.mxu1 %v2594_v25  ;;  %v2337_v20 = vcombine.low %v1606_v26, %v1610_v29  ;;  %v2339_v25 = vcombine.low %v1607_v35, %v1611_v27 }
  0x8f   : > { %1854 = vmatprep.subr.bf16.mxu0 %v2346_v22  ;;  %1895 = vmatprep.subr.bf16.mxu1 %v2348_v23 }
  0x90   : > { %1878 = vmatprep.mubr.bf16.mxu0 %v2396_v0  ;;  %1919 = vmatprep.mubr.bf16.mxu1 %v2396_v0 }
  0x92   : > { %1855 = vmatpush1.bf16.msra.mxu0 %v2345_v19  ;;  %1896 = vmatpush1.bf16.msra.mxu1 %v2347_v24 }
  0x93   : > { %1856 = vmatprep.subr.bf16.mxu0 %v2338_v30  ;;  %1897 = vmatprep.subr.bf16.mxu1 %v2340_v31 }
  0x96   : > { %1857 = vmatpush1.bf16.msra.mxu0 %v2337_v20  ;;  %1898 = vmatpush1.bf16.msra.mxu1 %v2339_v25 }
  0x97   : > { %1858 = vmatprep.subr.bf16.mxu0 %v2330_v38  ;;  %1899 = vmatprep.subr.bf16.mxu1 %v2332_v39 }
  0x9a   : > { %1859 = vmatpush1.bf16.msra.mxu0 %v2329_v43  ;;  %1900 = vmatpush1.bf16.msra.mxu1 %v2331_v44 }
  0x9b   : > { %1860 = vmatprep.subr.bf16.mxu0 %v2322_v45  ;;  %1901 = vmatprep.subr.bf16.mxu1 %v2324_v46 }
  0x9e   : > { %1861 = vmatpush1.bf16.msra.mxu0 %v2321_v47  ;;  %1902 = vmatpush1.bf16.msra.mxu1 %v2323_v48 }
  0x9f   : > { %1934 = vmatprep.subr.bf16.mxu0 %v2613_v50  ;;  %1975 = vmatprep.subr.bf16.mxu1 %v2621_v59  ;;  %v2349_v50 = vcombine.low %v1616_v49, %v1620_v52  ;;  %v2351_v59 = vcombine.low %v1617_v53, %v1621_v54 }
  0xa1   : > { %2361 = vmatmul.mubr.msk.bf16.vlgmr.msra.gmra.mxu0 %vm546_vm2, %v2494_v62  ;;  %2362 = vmatmul.mubr.msk.bf16.vlgmr.msra.gmra.mxu1 %vm546_vm2, %v2494_v62 }
  0xa2   : > { %1935 = vmatpush1.bf16.msra.mxu0 %v2616_v51  ;;  %1976 = vmatpush1.bf16.msra.mxu1 %v2624_v60  ;;  %v2341_v51 = vcombine.low %v1608_v61, %v1612_v63  ;;  %v2343_v60 = vcombine.low %v1609_v1, %v1613_v2 }
  0xa3   : > { %1936 = vmatprep.subr.bf16.mxu0 %v2350_v56  ;;  %1977 = vmatprep.subr.bf16.mxu1 %v2352_v57 }
  0xa4   : > { %1960 = vmatprep.mubr.bf16.mxu0 %v2396_v0  ;;  %2001 = vmatprep.mubr.bf16.mxu1 %v2396_v0  ;;  %v2328_v0 = vcombine.high %v1593_v12, %v1597_v13 }
  0xa6   : > { %1937 = vmatpush1.bf16.msra.mxu0 %v2349_v50  ;;  %1978 = vmatpush1.bf16.msra.mxu1 %v2351_v59 }
  0xa7   : > { %1938 = vmatprep.subr.bf16.mxu0 %v2342_v3  ;;  %1979 = vmatprep.subr.bf16.mxu1 %v2344_v4 }
  0xaa   : > { %1939 = vmatpush1.bf16.msra.mxu0 %v2341_v51  ;;  %1980 = vmatpush1.bf16.msra.mxu1 %v2343_v60 }
  0xab   : > { %1940 = vmatprep.subr.bf16.mxu0 %v2334_v8  ;;  %1981 = vmatprep.subr.bf16.mxu1 %v2336_v9 }
  0xae   : > { %1941 = vmatpush1.bf16.msra.mxu0 %v2333_v14  ;;  %1982 = vmatpush1.bf16.msra.mxu1 %v2335_v15 }
  0xaf   : > { %1942 = vmatprep.subr.bf16.mxu0 %v2326_v16  ;;  %1983 = vmatprep.subr.bf16.mxu1 %v2328_v0 }
  0xb2   : > { %1943 = vmatpush1.bf16.msra.mxu0 %v2325_v28  ;;  %1984 = vmatpush1.bf16.msra.mxu1 %v2327_v34 }
  0xb5   : > { %2363 = vmatmul.mubr.msk.bf16.vlgmr.msra.gmra.mxu0 %vm546_vm2, %v2494_v62  ;;  %2364 = vmatmul.mubr.msk.bf16.vlgmr.msra.gmra.mxu1 %vm546_vm2, %v2494_v62 }
  0xe4   : > { %v2030_v0 = vpop.permute.xlu0 %2029 }
  0xe9   : > { %v2769_v17 = vpop.f32.mrf.mxu0  ;;  %v2771_v18 = vpop.f32.mrf.mxu1 }
  0xeb   : > { %v2773_v21 = vpop.f32.mrf.mxu0  ;;  %v2775_v22 = vpop.f32.mrf.mxu1 }
  0xed   : > { %v616_v23 = vpop.f32.mrf.mxu0  ;;  %v657_v26 = vpop.f32.mrf.mxu1 }
  0xef   : > { %v617_v29 = vpop.f32.mrf.mxu0  ;;  %v658_v35 = vpop.f32.mrf.mxu1 }
  0xfd   : > { %v2777_v27 = vpop.f32.mrf.mxu0  ;;  %v2779_v19 = vpop.f32.mrf.mxu1 }
  0xff   : > { %v2781_v24 = vpop.f32.mrf.mxu0  ;;  %v2783_v30 = vpop.f32.mrf.mxu1 }
 0x101   : > { %v698_v62 = vpop.f32.mrf.mxu0  ;;  %v739_v31 = vpop.f32.mrf.mxu1 }
 0x103   : > { %v699_v32 = vpop.f32.mrf.mxu0  ;;  %v740_v33 = vpop.f32.mrf.mxu1 }
 0x111   : > { %v1032_v36 = vpop.f32.mrf.mxu0  ;;  %v1073_v20 = vpop.f32.mrf.mxu1 }
 0x112   : > { %v1162_v37 = vmax.f32 %v2769_v17, %v1032_v36  ;;  %v1164_v25 = vmax.f32 %v2771_v18, %v1073_v20 }
 0x113   : > { %v1034_v38 = vpop.f32.mrf.mxu0  ;;  %v1075_v5 = vpop.f32.mrf.mxu1 }
 0x114   : > { %v1163_v39 = vmax.f32 %v2773_v21, %v1034_v38  ;;  %v1165_v40 = vmax.f32 %v2775_v22, %v1075_v5 }
 0x115   : > { %v1036_v41 = vpop.f32.mrf.mxu0  ;;  %v1077_v42 = vpop.f32.mrf.mxu1 }
 0x117   : > { %v1037_v43 = vpop.f32.mrf.mxu0  ;;  %v1078_v44 = vpop.f32.mrf.mxu1 }
 0x125   : > { %v2789_v45 = vpop.f32.mrf.mxu0  ;;  %v2793_v47 = vpop.f32.mrf.mxu1 }
 0x126   : > { %v1166_v46 = vmax.f32 %v2777_v27, %v2789_v45  ;;  %v1168_v48 = vmax.f32 %v2779_v19, %v2793_v47 }
 0x127   : > { %v2797_v49 = vpop.f32.mrf.mxu0  ;;  %v2801_v53 = vpop.f32.mrf.mxu1 }
 0x128   : > { %v1167_v52 = vmax.f32 %v2781_v24, %v2797_v49  ;;  %v1169_v54 = vmax.f32 %v2783_v30, %v2801_v53 }
 0x129   : > { %v1118_v56 = vpop.f32.mrf.mxu0  ;;  %v1159_v57 = vpop.f32.mrf.mxu1 }
 0x12b   : > { %v1119_v61 = vpop.f32.mrf.mxu0  ;;  %v1160_v63 = vpop.f32.mrf.mxu1 }
 0x139   : > { %v1460_v1 = vpop.f32.mrf.mxu0  ;;  %v1501_v2 = vpop.f32.mrf.mxu1 }
 0x13b   : > { %v1462_v50 = vpop.f32.mrf.mxu0  ;;  %v1503_v59 = vpop.f32.mrf.mxu1 }
 0x13d   : > { %v1464_v3 = vpop.f32.mrf.mxu0  ;;  %v1505_v4 = vpop.f32.mrf.mxu1 }
 0x13f   : > { %v1465_v55 = vpop.f32.mrf.mxu0  ;;  %v1506_v58 = vpop.f32.mrf.mxu1 }
 0x14d   : > { %v1542_v6 = vpop.f32.mrf.mxu0  ;;  %v1583_v7 = vpop.f32.mrf.mxu1 }
 0x14f   : > { %v1544_v51 = vpop.f32.mrf.mxu0  ;;  %v1585_v60 = vpop.f32.mrf.mxu1 }
 0x151   : > { %v1546_v8 = vpop.f32.mrf.mxu0  ;;  %v1587_v9 = vpop.f32.mrf.mxu1 }
 0x153   : > { %v1547_v10 = vpop.f32.mrf.mxu0  ;;  %v1588_v11 = vpop.f32.mrf.mxu1 }
 0x161   : > { %v1880_v12 = vpop.f32.mrf.mxu0  ;;  %v1921_v14 = vpop.f32.mrf.mxu1 }
 0x162   : > { %v2010_v13 = vmax.f32 %v1460_v1, %v1880_v12  ;;  %v2012_v15 = vmax.f32 %v1501_v2, %v1921_v14 }
 0x163   : > { %v1882_v16 = vpop.f32.mrf.mxu0  ;;  %v1923_v17 = vpop.f32.mrf.mxu1 }
 0x164   : > { %v2018_v28 = vmax.f32 %v1162_v37, %v2010_v13  ;;  %v2011_v34 = vmax.f32 %v1462_v50, %v1882_v16  ;;  %v2020_v18 = vmax.f32 %v1164_v25, %v2012_v15  ;;  %v2013_v21 = vmax.f32 %v1503_v59, %v1923_v17 }
 0x165   : > { %v1884_v22 = vpop.f32.mrf.mxu0  ;;  %v1925_v29 = vpop.f32.mrf.mxu1 }
 0x166   : > { %v2019_v23 = vmax.f32 %v1163_v39, %v2011_v34  ;;  %v2032_v26 = vadd.f32 %v2030_v0, %v2018_v28  ;;  %v2021_v35 = vmax.f32 %v1165_v40, %v2013_v21  ;;  %v2034_v62 = vadd.f32 %v2030_v0, %v2020_v18 }
 0x167   : > { %v1885_v31 = vpop.f32.mrf.mxu0  ;;  %v1926_v33 = vpop.f32.mrf.mxu1 }
 0x168   : > { %v2033_v32 = vadd.f32 %v2030_v0, %v2019_v23  ;;  %v2035_v36 = vadd.f32 %v2030_v0, %v2021_v35  ;;  %v2040_v20 = vmax.f32 %v2032_v26, 0.0  ;;  %v2042_v5 = vmax.f32 %v2034_v62, 0.0 }
 0x16a   : > { %v2041_v38 = vmax.f32 %v2033_v32, 0.0  ;;  %v2043_v41 = vmax.f32 %v2035_v36, 0.0 }
 0x16c   : > { %v2372_v37 = vpack.c.bf16 %v2041_v38, %v2040_v20  ;;  %v2373_v25 = vpack.c.bf16 %v2043_v41, %v2042_v5 }
 0x16e   : > { %2080 = vst [vmem:[%s2809_s19] sm:$0x77] %v2372_v37  ;;  %2081 = vst [vmem:[%s2809_s19 + $0x8] sm:$0x77] %v2373_v25 }
 0x175   : > { %v1962_v39 = vpop.f32.mrf.mxu0  ;;  %v2003_v42 = vpop.f32.mrf.mxu1 }
 0x176   : > { %v2014_v40 = vmax.f32 %v1542_v6, %v1962_v39  ;;  %v2016_v43 = vmax.f32 %v1583_v7, %v2003_v42 }
 0x177   : > { %v1964_v44 = vpop.f32.mrf.mxu0  ;;  %v2005_v61 = vpop.f32.mrf.mxu1 }
 0x178   : > { %v2022_v56 = vmax.f32 %v1166_v46, %v2014_v40  ;;  %v2015_v57 = vmax.f32 %v1544_v51, %v1964_v44  ;;  %v2024_v63 = vmax.f32 %v1168_v48, %v2016_v43  ;;  %v2017_v1 = vmax.f32 %v1585_v60, %v2005_v61 }
 0x179   : > { %v1966_v2 = vpop.f32.mrf.mxu0  ;;  %v2007_v3 = vpop.f32.mrf.mxu1 }
 0x17a   : > { %v2036_v50 = vadd.f32 %v2030_v0, %v2022_v56  ;;  %v2023_v59 = vmax.f32 %v1167_v52, %v2015_v57  ;;  %v2038_v4 = vadd.f32 %v2030_v0, %v2024_v63  ;;  %v2025_v27 = vmax.f32 %v1169_v54, %v2017_v1 }
 0x17b   : > { %v1967_v45 = vpop.f32.mrf.mxu0  ;;  %v2008_v55 = vpop.f32.mrf.mxu1 }
 0x17c   : > { %v2037_v46 = vadd.f32 %v2030_v0, %v2023_v59  ;;  %v2039_v19 = vadd.f32 %v2030_v0, %v2025_v27  ;;  %v2044_v47 = vmax.f32 %v2036_v50, 0.0  ;;  %v2046_v58 = vmax.f32 %v2038_v4, 0.0 }
 0x17e   : > { %v2045_v48 = vmax.f32 %v2037_v46, 0.0  ;;  %v2047_v6 = vmax.f32 %v2039_v19, 0.0 }
 0x180   : > { %v2374_v24 = vpack.c.bf16 %v2045_v48, %v2044_v47  ;;  %v2375_v49 = vpack.c.bf16 %v2047_v6, %v2046_v58 }
 0x182   : > { %2082 = vst [vmem:[%s2809_s19 + $0x10] sm:$0x77] %v2374_v24  ;;  %2086 = vst.msk [vmem:[%s2809_s19 + $0x18] sm:$0x77] %vm2085_vm5, %v2375_v49 }
 0x183 PF: > { %s16_s21 = sadd.s32 1, %s2394_s21  }
 0x184   : > { %p13_p4 = scmp.ge.s32.totalorder %s16_s21, 4  }
 0x186   :  { %15 = sbr.rel (!%p13_p4) target bundleno = 1 (0x1), region = 83 }

// kernel: cnn_forward.5
= control target key start
LH: loop header
LB: loop body
LE: loop exit
PB: predicated region body
PF: predicated region fallthrough
CT: control target
= control target key end

     0   :  { %s1403_s21 = smov 0   ;;  %s1560_s0 = inlined_call_operand.vmem [shape: bf16[2,150,196], index: 0, kind: input, shape index: {}]   ;;  %s1561_s1 = inlined_call_operand.vmem [shape: bf16[2,150,196], index: 1, kind: input, shape index: {}]   ;;  %s1562_s2 = inlined_call_operand.vmem [shape: bf16[2,150,196], index: 2, kind: input, shape index: {}]   ;;  %s1563_s3 = inlined_call_operand.vmem [shape: bf16[2,150,196], index: 3, kind: input, shape index: {}]   ;;  %s1564_s4 = inlined_call_operand.vmem [shape: bf16[16,150], index: 4, kind: input, shape index: {}]   ;;  %s1565_s5 = inlined_call_operand.vmem [shape: f32[16,1], index: 5, kind: input, shape index: {}]   ;;  %s1566_s6 = inlined_call_operand.vmem [shape: bf16[2,16,196], index: 6, kind: output, shape index: {}]  }
   0x1 LB: > { %s1121_s22 = sadd.s32 4294967295, %s1365_s21   ;;  %p1125_p0 = scmp.ge.s32.totalorder %s1365_s21, 1  ;;  %s1365_s21 = sphi %s1403_s21, %s16_s21  }
   0x2   : > { %p242_p1 = scmp.lt.s32.totalorder %s1365_s21, 3 }
   0x4   : > { %p243_p2 = pnand %p1125_p0, %p242_p1 }
   0x5   : > { %p287_p3 = scmp.lt.s32.totalorder (!%p243_p2), %s1121_s22, 1 }
   0x6   : > { %246 = sbr.rel (%p243_p2) target bundleno = 307 (0x133), region = 44 }
   0xb   : > { %v1414_v0 = vld [vmem:[%s1564_s4 + $0x4] ss:$8 sps:$4 sm:$0xff]   ;;  %vm438_vm0 = vcmask 179200   ;;  %s1568_s22 = smov (!%p287_p3, %s1121_s22), 1  ;;  %v1367_v2 = vmov 0   ;;  %vm442_vm1 = vcmask 1042432  }
   0xc   : > { %v993_v1 = vld [vmem:[%s1565_s5] sm:$0xff]  ;;  %1155 = vmatprep.mubr.msk.bf16.mxu0 %vm438_vm0, %v1414_v0  ;;  %1177 = vmatprep.mubr.msk.bf16.mxu1 %vm438_vm0, %v1414_v0  ;;  %s1426_s27 = smul.u32 152, %s1568_s22  ;;  %v994_v3 = vld [vmem:[%s1565_s5 + $0x8] sm:$0xff]  ;;  %vm1025_vm2 = vcmask 1043456   ;;  %vm1026_vm3 = vcmask 556036   ;;  %s1226_s20 = sshll.u32 %s1568_s22, 4 }
   0xd   : > { %1239 = vset.pattern.permute.xlu0 %v1367_v2  ;;  %v1502_v50 = vld [vmem:[%s1564_s4] ss:$8 sps:$4 sm:$0xff]   ;;  %s311_s25 = scalar_lea.vmem %s1566_s6, %s1226_s20  ;;  %vm1027_vm4 = vmor %vm1026_vm3, %vm1025_vm2 }
   0xe   : > { %997 = vperm.xlu0 %1239, %v993_v1   ;;  %s1435_s8 = scalar_lea.vmem %s1560_s0, %s1426_s27  ;;  %s1441_s11 = scalar_lea.vmem %s1561_s1, %s1426_s27 }
   0xf   : > { %v1240_v4 = vld [vmem:[%s1435_s8 + $0x74] ss:$8 sps:$4 sm:$0xff]   ;;  %v1244_v6 = vld [vmem:[%s1435_s8 + $0x70] ss:$8 sps:$4 sm:$0xff]   ;;  %v1246_v8 = vld [vmem:[%s1435_s8 + $0x64] ss:$8 sps:$4 sm:$0xff]   ;;  %s1477_s14 = scalar_lea.vmem %s1562_s2, %s1426_s27  ;;  %s1484_s17 = scalar_lea.vmem %s1563_s3, %s1426_s27 }
  0x10   : > { %v1242_v5 = vld [vmem:[%s1441_s11 + $0x74] ss:$8 sps:$4 sm:$0xff]   ;;  %449 = vmatprep.subr.bf16.mxu0 %v1240_v4  ;;  %v1245_v7 = vld [vmem:[%s1441_s11 + $0x70] ss:$8 sps:$4 sm:$0xff]   ;;  %v1248_v9 = vld [vmem:[%s1441_s11 + $0x64] ss:$8 sps:$4 sm:$0xff]  }
  0x11   : > { %612 = vmatprep.subr.bf16.mxu1 %v1242_v5  ;;  %450 = vmatpush1.bf16.msra.mxu0 %v1244_v6  ;;  %v1250_v10 = vld [vmem:[%s1435_s8 + $0x60] ss:$8 sps:$4 sm:$0xff]   ;;  %v1252_v12 = vld [vmem:[%s1435_s8 + $0x54] ss:$8 sps:$4 sm:$0xff]   ;;  %v1256_v14 = vld [vmem:[%s1435_s8 + $0x50] ss:$8 sps:$4 sm:$0xff]  }
  0x12   : > { %1002 = vperm.xlu0 %1239, %v994_v3   ;;  %613 = vmatpush1.bf16.msra.mxu1 %v1245_v7  ;;  %v1251_v11 = vld [vmem:[%s1441_s11 + $0x60] ss:$8 sps:$4 sm:$0xff]   ;;  %v1254_v13 = vld [vmem:[%s1441_s11 + $0x54] ss:$8 sps:$4 sm:$0xff]   ;;  %v1257_v15 = vld [vmem:[%s1441_s11 + $0x50] ss:$8 sps:$4 sm:$0xff]  }
  0x13   : > { %451 = vmatprep.subr.bf16.mxu0 %v1246_v8  ;;  %614 = vmatprep.subr.bf16.mxu1 %v1248_v9  ;;  %v1258_v16 = vld [vmem:[%s1435_s8 + $0x44] ss:$8 sps:$4 sm:$0xff]   ;;  %v1262_v18 = vld [vmem:[%s1435_s8 + $0x40] ss:$8 sps:$4 sm:$0xff]   ;;  %v1264_v20 = vld [vmem:[%s1435_s8 + $0x34] ss:$8 sps:$4 sm:$0xff]  }
  0x14   : > { %v1260_v17 = vld [vmem:[%s1441_s11 + $0x44] ss:$8 sps:$4 sm:$0xff]   ;;  %v1263_v19 = vld [vmem:[%s1441_s11 + $0x40] ss:$8 sps:$4 sm:$0xff]   ;;  %v1266_v21 = vld [vmem:[%s1441_s11 + $0x34] ss:$8 sps:$4 sm:$0xff]  }
  0x15   : > { %452 = vmatpush1.bf16.msra.mxu0 %v1250_v10  ;;  %v1268_v22 = vld [vmem:[%s1435_s8 + $0x30] ss:$8 sps:$4 sm:$0xff]   ;;  %v1270_v24 = vld [vmem:[%s1435_s8 + $0x24] ss:$8 sps:$4 sm:$0xff]   ;;  %v1274_v26 = vld [vmem:[%s1435_s8 + $0x20] ss:$8 sps:$4 sm:$0xff]  }
  0x16   : > { %615 = vmatpush1.bf16.msra.mxu1 %v1251_v11  ;;  %453 = vmatprep.subr.bf16.mxu0 %v1252_v12  ;;  %v1269_v23 = vld [vmem:[%s1441_s11 + $0x30] ss:$8 sps:$4 sm:$0xff]   ;;  %v1272_v25 = vld [vmem:[%s1441_s11 + $0x24] ss:$8 sps:$4 sm:$0xff]   ;;  %v1275_v27 = vld [vmem:[%s1441_s11 + $0x20] ss:$8 sps:$4 sm:$0xff]  }
  0x17   : > { %616 = vmatprep.subr.bf16.mxu1 %v1254_v13  ;;  %v1276_v28 = vld [vmem:[%s1435_s8 + $0x14] ss:$8 sps:$4 sm:$0xff]   ;;  %v1280_v30 = vld [vmem:[%s1435_s8 + $0x10] ss:$8 sps:$4 sm:$0xff]   ;;  %v1282_v32 = vld [vmem:[%s1435_s8 + $0x4] ss:$8 sps:$4 sm:$0xff]  }
  0x18   : > { %v1278_v29 = vld [vmem:[%s1441_s11 + $0x14] ss:$8 sps:$4 sm:$0xff]   ;;  %v1281_v31 = vld [vmem:[%s1441_s11 + $0x10] ss:$8 sps:$4 sm:$0xff]   ;;  %v1284_v33 = vld [vmem:[%s1441_s11 + $0x4] ss:$8 sps:$4 sm:$0xff]  }
  0x19   : > { %454 = vmatpush1.bf16.msra.mxu0 %v1256_v14  ;;  %v333_v34 = vld [vmem:[%s1435_s8 + $0x90] sm:$0x77]  ;;  %v1286_v36 = vld [vmem:[%s1435_s8] ss:$8 sps:$4 sm:$0xff]   ;;  %v1292_v42 = vld [vmem:[%s1435_s8 + $0x84] ss:$8 sps:$4 sm:$0xff]  }
  0x1a   : > { %617 = vmatpush1.bf16.msra.mxu1 %v1257_v15  ;;  %455 = vmatprep.subr.bf16.mxu0 %v1258_v16  ;;  %v510_v35 = vld [vmem:[%s1441_s11 + $0x90] sm:$0x77]  ;;  %v1287_v37 = vld [vmem:[%s1441_s11] ss:$8 sps:$4 sm:$0xff]   ;;  %v1153_v38 = vcombine.high %v333_v34, %v333_v34  ;;  %v1152_v40 = vcombine.low %v333_v34, %v333_v34  ;;  %v1294_v45 = vld [vmem:[%s1441_s11 + $0x84] ss:$8 sps:$4 sm:$0xff]  }
  0x1b   : > { %618 = vmatprep.subr.bf16.mxu1 %v1260_v17  ;;  %v1175_v39 = vcombine.high %v510_v35, %v510_v35  ;;  %v1174_v41 = vcombine.low %v510_v35, %v510_v35  ;;  %v1296_v46 = vld [vmem:[%s1435_s8 + $0x80] ss:$8 sps:$4 sm:$0xff]   ;;  %v1303_v48 = vld [vmem:[%s1477_s14 + $0x74] ss:$8 sps:$4 sm:$0xff]   ;;  %v1301_v51 = vld [vmem:[%s1477_s14 + $0x70] ss:$8 sps:$4 sm:$0xff]  }
  0x1c   : > { %v444_v43 = vsel %vm442_vm1, %v1152_v40, 0  ;;  %v1297_v47 = vld [vmem:[%s1441_s11 + $0x80] ss:$8 sps:$4 sm:$0xff]   ;;  %v1306_v49 = vld [vmem:[%s1484_s17 + $0x74] ss:$8 sps:$4 sm:$0xff]  }
  0x1d   : > { %456 = vmatpush1.bf16.msra.mxu0 %v1262_v18  ;;  %v607_v44 = vsel %vm442_vm1, %v1174_v41, 0  ;;  %v1304_v52 = vld [vmem:[%s1484_s17 + $0x70] ss:$8 sps:$4 sm:$0xff]   ;;  %v1309_v53 = vld [vmem:[%s1477_s14 + $0x64] ss:$8 sps:$4 sm:$0xff]  }
  0x1e   : > { %619 = vmatpush1.bf16.msra.mxu1 %v1263_v19  ;;  %457 = vmatprep.subr.bf16.mxu0 %v1264_v20  ;;  %v1312_v54 = vld [vmem:[%s1484_s17 + $0x64] ss:$8 sps:$4 sm:$0xff]   ;;  %v1307_v55 = vld [vmem:[%s1477_s14 + $0x60] ss:$8 sps:$4 sm:$0xff]   ;;  %v1315_v57 = vld [vmem:[%s1477_s14 + $0x54] ss:$8 sps:$4 sm:$0xff]  }
  0x1f   : > { %620 = vmatprep.subr.bf16.mxu1 %v1266_v21  ;;  %v1310_v56 = vld [vmem:[%s1484_s17 + $0x60] ss:$8 sps:$4 sm:$0xff]   ;;  %v1318_v58 = vld [vmem:[%s1484_s17 + $0x54] ss:$8 sps:$4 sm:$0xff]   ;;  %v1313_v59 = vld [vmem:[%s1477_s14 + $0x50] ss:$8 sps:$4 sm:$0xff]  }
  0x20   : > { %v1316_v60 = vld [vmem:[%s1484_s17 + $0x50] ss:$8 sps:$4 sm:$0xff]   ;;  %v1321_v61 = vld [vmem:[%s1477_s14 + $0x44] ss:$8 sps:$4 sm:$0xff]   ;;  %v1319_v63 = vld [vmem:[%s1477_s14 + $0x40] ss:$8 sps:$4 sm:$0xff]  }
  0x21   : > { %458 = vmatpush1.bf16.msra.mxu0 %v1268_v22  ;;  %v1324_v62 = vld [vmem:[%s1484_s17 + $0x44] ss:$8 sps:$4 sm:$0xff]   ;;  %v1322_v1 = vld [vmem:[%s1484_s17 + $0x40] ss:$8 sps:$4 sm:$0xff]   ;;  %v1330_v2 = vld [vmem:[%s1484_s17 + $0x34] ss:$8 sps:$4 sm:$0xff]  }
  0x22   : > { %621 = vmatpush1.bf16.msra.mxu1 %v1269_v23  ;;  %459 = vmatprep.subr.bf16.mxu0 %v1270_v24  ;;  %v1325_v3 = vld [vmem:[%s1477_s14 + $0x30] ss:$8 sps:$4 sm:$0xff]   ;;  %v1333_v5 = vld [vmem:[%s1477_s14 + $0x24] ss:$8 sps:$4 sm:$0xff]   ;;  %v1331_v7 = vld [vmem:[%s1477_s14 + $0x20] ss:$8 sps:$4 sm:$0xff]  }
  0x23   : > { %622 = vmatprep.subr.bf16.mxu1 %v1272_v25  ;;  %v1328_v4 = vld [vmem:[%s1484_s17 + $0x30] ss:$8 sps:$4 sm:$0xff]   ;;  %v1336_v6 = vld [vmem:[%s1484_s17 + $0x24] ss:$8 sps:$4 sm:$0xff]   ;;  %v1334_v8 = vld [vmem:[%s1484_s17 + $0x20] ss:$8 sps:$4 sm:$0xff]  }
  0x24   : > { %v1339_v9 = vld [vmem:[%s1477_s14 + $0x14] ss:$8 sps:$4 sm:$0xff]   ;;  %v1337_v11 = vld [vmem:[%s1477_s14 + $0x10] ss:$8 sps:$4 sm:$0xff]   ;;  %v1345_v13 = vld [vmem:[%s1477_s14 + $0x4] ss:$8 sps:$4 sm:$0xff]  }
  0x25   : > { %460 = vmatpush1.bf16.msra.mxu0 %v1274_v26  ;;  %v1342_v10 = vld [vmem:[%s1484_s17 + $0x14] ss:$8 sps:$4 sm:$0xff]   ;;  %v1340_v12 = vld [vmem:[%s1484_s17 + $0x10] ss:$8 sps:$4 sm:$0xff]   ;;  %v1348_v14 = vld [vmem:[%s1484_s17 + $0x4] ss:$8 sps:$4 sm:$0xff]  }
  0x26   : > { %623 = vmatpush1.bf16.msra.mxu1 %v1275_v27  ;;  %461 = vmatprep.subr.bf16.mxu0 %v1276_v28  ;;  %v677_v15 = vld [vmem:[%s1477_s14 + $0x90] sm:$0x77]  ;;  %v1343_v17 = vld [vmem:[%s1477_s14] ss:$8 sps:$4 sm:$0xff]   ;;  %v1355_v25 = vld [vmem:[%s1477_s14 + $0x84] ss:$8 sps:$4 sm:$0xff]  }
  0x27   : > { %624 = vmatprep.subr.bf16.mxu1 %v1278_v29  ;;  %v840_v16 = vld [vmem:[%s1484_s17 + $0x90] sm:$0x77]  ;;  %v1346_v18 = vld [vmem:[%s1484_s17] ss:$8 sps:$4 sm:$0xff]   ;;  %v1197_v19 = vcombine.high %v677_v15, %v677_v15  ;;  %v1196_v21 = vcombine.low %v677_v15, %v677_v15  ;;  %v1358_v26 = vld [vmem:[%s1484_s17 + $0x84] ss:$8 sps:$4 sm:$0xff]  }
  0x28   : > { %v1219_v20 = vcombine.high %v840_v16, %v840_v16  ;;  %v1218_v22 = vcombine.low %v840_v16, %v840_v16  ;;  %v1353_v27 = vld [vmem:[%s1477_s14 + $0x80] ss:$8 sps:$4 sm:$0xff]  }
  0x29   : > { %462 = vmatpush1.bf16.msra.mxu0 %v1280_v30  ;;  %v774_v23 = vsel %vm442_vm1, %v1196_v21, 0  ;;  %v1356_v28 = vld [vmem:[%s1484_s17 + $0x80] ss:$8 sps:$4 sm:$0xff]  }
  0x2a   : > { %625 = vmatpush1.bf16.msra.mxu1 %v1281_v31  ;;  %463 = vmatprep.subr.bf16.mxu0 %v1282_v32  ;;  %v937_v24 = vsel %vm442_vm1, %v1218_v22, 0 }
  0x2b   : > { %626 = vmatprep.subr.bf16.mxu1 %v1284_v33 }
  0x2d   : > { %464 = vmatpush1.bf16.msra.mxu0 %v1286_v36 }
  0x2e   : > { %627 = vmatpush1.bf16.msra.mxu1 %v1287_v37  ;;  %1154 = vmatprep.subr.msk.bf16.mxu0 %vm442_vm1, %v1153_v38 }
  0x2f   : > { %1176 = vmatprep.subr.msk.bf16.mxu1 %vm442_vm1, %v1175_v39 }
  0x31   : > { %478 = vmatpush2.bf16.msra.mxu0 %v444_v43 }
  0x32   : > { %641 = vmatpush2.bf16.msra.mxu1 %v607_v44  ;;  %479 = vmatprep.subr.bf16.mxu0 %v1292_v42 }
  0x33   : > { %642 = vmatprep.subr.bf16.mxu1 %v1294_v45 }
  0x35   : > { %480 = vmatpush2.bf16.msra.mxu0 %v1296_v46 }
  0x36   : > { %643 = vmatpush2.bf16.msra.mxu1 %v1297_v47  ;;  %779 = vmatprep.subr.bf16.mxu0 %v1303_v48 }
  0x37   : > { %942 = vmatprep.subr.bf16.mxu1 %v1306_v49 }
  0x38   : > { %482 = vmatmul.mubr.bf16.vlgmr.msra.gmra.mxu0 %v1502_v50 }
  0x39   : > { %645 = vmatmul.mubr.bf16.vlgmr.msra.gmra.mxu1 %v1502_v50  ;;  %780 = vmatpush1.bf16.msra.mxu0 %v1301_v51 }
  0x3a   : > { %943 = vmatpush1.bf16.msra.mxu1 %v1304_v52  ;;  %781 = vmatprep.subr.bf16.mxu0 %v1309_v53 }
  0x3b   : > { %944 = vmatprep.subr.bf16.mxu1 %v1312_v54  ;;  %1199 = vmatprep.mubr.msk.bf16.mxu0 %vm438_vm0, %v1414_v0 }
  0x3c   : > { %1221 = vmatprep.mubr.msk.bf16.mxu1 %vm438_vm0, %v1414_v0  ;;  %v1327_v0 = vld [vmem:[%s1477_s14 + $0x34] ss:$8 sps:$4 sm:$0xff]  }
  0x3d   : > { %782 = vmatpush1.bf16.msra.mxu0 %v1307_v55 }
  0x3e   : > { %945 = vmatpush1.bf16.msra.mxu1 %v1310_v56  ;;  %783 = vmatprep.subr.bf16.mxu0 %v1315_v57 }
  0x3f   : > { %946 = vmatprep.subr.bf16.mxu1 %v1318_v58 }
  0x41   : > { %784 = vmatpush1.bf16.msra.mxu0 %v1313_v59 }
  0x42   : > { %947 = vmatpush1.bf16.msra.mxu1 %v1316_v60  ;;  %785 = vmatprep.subr.bf16.mxu0 %v1321_v61 }
  0x43   : > { %948 = vmatprep.subr.bf16.mxu1 %v1324_v62 }
  0x45   : > { %786 = vmatpush1.bf16.msra.mxu0 %v1319_v63 }
  0x46   : > { %949 = vmatpush1.bf16.msra.mxu1 %v1322_v1  ;;  %787 = vmatprep.subr.bf16.mxu0 %v1327_v0 }
  0x47   : > { %950 = vmatprep.subr.bf16.mxu1 %v1330_v2 }
  0x49   : > { %788 = vmatpush1.bf16.msra.mxu0 %v1325_v3 }
  0x4a   : > { %951 = vmatpush1.bf16.msra.mxu1 %v1328_v4  ;;  %789 = vmatprep.subr.bf16.mxu0 %v1333_v5 }
  0x4b   : > { %952 = vmatprep.subr.bf16.mxu1 %v1336_v6 }
  0x4d   : > { %790 = vmatpush1.bf16.msra.mxu0 %v1331_v7 }
  0x4e   : > { %953 = vmatpush1.bf16.msra.mxu1 %v1334_v8  ;;  %791 = vmatprep.subr.bf16.mxu0 %v1339_v9 }
  0x4f   : > { %954 = vmatprep.subr.bf16.mxu1 %v1342_v10 }
  0x51   : > { %792 = vmatpush1.bf16.msra.mxu0 %v1337_v11 }
  0x52   : > { %955 = vmatpush1.bf16.msra.mxu1 %v1340_v12  ;;  %793 = vmatprep.subr.bf16.mxu0 %v1345_v13 }
  0x53   : > { %956 = vmatprep.subr.bf16.mxu1 %v1348_v14 }
  0x55   : > { %794 = vmatpush1.bf16.msra.mxu0 %v1343_v17 }
  0x56   : > { %957 = vmatpush1.bf16.msra.mxu1 %v1346_v18  ;;  %1198 = vmatprep.subr.msk.bf16.mxu0 %vm442_vm1, %v1197_v19 }
  0x57   : > { %1220 = vmatprep.subr.msk.bf16.mxu1 %vm442_vm1, %v1219_v20 }
  0x59   : > { %808 = vmatpush2.bf16.msra.mxu0 %v774_v23 }
  0x5a   : > { %971 = vmatpush2.bf16.msra.mxu1 %v937_v24  ;;  %809 = vmatprep.subr.bf16.mxu0 %v1355_v25 }
  0x5b   : > { %972 = vmatprep.subr.bf16.mxu1 %v1358_v26 }
  0x5d   : > { %810 = vmatpush2.bf16.msra.mxu0 %v1353_v27 }
  0x5e   : > { %973 = vmatpush2.bf16.msra.mxu1 %v1356_v28 }
  0x60   : > { %812 = vmatmul.mubr.bf16.vlgmr.msra.gmra.mxu0 %v1502_v50 }
  0x61   : > { %975 = vmatmul.mubr.bf16.vlgmr.msra.gmra.mxu1 %v1502_v50 }
  0x89   : > { %v998_v41 = vpop.permute.xlu0 %997 }
  0x8d   : > { %v1003_v59 = vpop.permute.xlu0 %1002 }
  0xf8   : > { %v483_v29 = vpop.f32.mrf.mxu0 }
  0xf9   : > { %v646_v30 = vpop.f32.mrf.mxu1 }
  0xfa   : > { %v485_v31 = vpop.f32.mrf.mxu0  ;;  %v655_v39 = vmax.f32 %v483_v29, %v646_v30 }
  0xfb   : > { %v648_v32 = vpop.f32.mrf.mxu1 }
  0xfc   : > { %v487_v33 = vpop.f32.mrf.mxu0  ;;  %v656_v44 = vmax.f32 %v485_v31, %v648_v32 }
  0xfd   : > { %v650_v34 = vpop.f32.mrf.mxu1 }
  0xfe   : > { %v489_v35 = vpop.f32.mrf.mxu0  ;;  %v657_v49 = vmax.f32 %v487_v33, %v650_v34 }
  0xff   : > { %v652_v36 = vpop.f32.mrf.mxu1 }
 0x100   : > { %v658_v55 = vmax.f32 %v489_v35, %v652_v36 }
 0x120   : > { %v813_v37 = vpop.f32.mrf.mxu0 }
 0x121   : > { %v976_v38 = vpop.f32.mrf.mxu1 }
 0x122   : > { %v985_v40 = vmax.f32 %v813_v37, %v976_v38  ;;  %v815_v42 = vpop.f32.mrf.mxu0 }
 0x123   : > { %v978_v43 = vpop.f32.mrf.mxu1 }
 0x124   : > { %v989_v45 = vmax.f32 %v655_v39, %v985_v40  ;;  %v986_v46 = vmax.f32 %v815_v42, %v978_v43  ;;  %v817_v47 = vpop.f32.mrf.mxu0 }
 0x125   : > { %v980_v48 = vpop.f32.mrf.mxu1 }
 0x126   : > { %v1005_v50 = vadd.f32 %v998_v41, %v989_v45  ;;  %v990_v51 = vmax.f32 %v656_v44, %v986_v46  ;;  %v987_v52 = vmax.f32 %v817_v47, %v980_v48  ;;  %v819_v53 = vpop.f32.mrf.mxu0 }
 0x127   : > { %v982_v54 = vpop.f32.mrf.mxu1 }
 0x128   : > { %v1006_v56 = vadd.f32 %v998_v41, %v990_v51  ;;  %v991_v57 = vmax.f32 %v657_v49, %v987_v52  ;;  %v988_v58 = vmax.f32 %v819_v53, %v982_v54  ;;  %v1009_v60 = vmax.f32 %v1005_v50, 0.0 }
 0x12a   : > { %v1010_v61 = vmax.f32 %v1006_v56, 0.0  ;;  %v1007_v62 = vadd.f32 %v1003_v59, %v991_v57  ;;  %v992_v63 = vmax.f32 %v658_v55, %v988_v58 }
 0x12c   : > { %v1227_v1 = vpack.c.bf16 %v1010_v61, %v1009_v60  ;;  %v1008_v0 = vadd.f32 %v1003_v59, %v992_v63  ;;  %v1011_v2 = vmax.f32 %v1007_v62, 0.0 }
 0x12e   : > { %1028 = vst.msk [vmem:[%s311_s25] sm:$0xff] %vm1027_vm4, %v1227_v1  ;;  %v1012_v3 = vmax.f32 %v1008_v0, 0.0 }
 0x130   : > { %v1228_v4 = vpack.c.bf16 %v1012_v3, %v1011_v2 }
 0x132   : > { %1029 = vst.msk [vmem:[%s311_s25 + $0x8] sm:$0xff] %vm1027_vm4, %v1228_v4 }
 0x133 PF: > { %s16_s21 = sadd.s32 1, %s1365_s21  }
 0x134   : > { %p13_p4 = scmp.ge.s32.totalorder %s16_s21, 4  }
 0x136   :  { %15 = sbr.rel (!%p13_p4) target bundleno = 1 (0x1), region = 83 }

// kernel: cnn_forward.6
= control target key start
LH: loop header
LB: loop body
LE: loop exit
PB: predicated region body
PF: predicated region fallthrough
CT: control target
= control target key end

     0   :  { %s2132_s21 = smov 0   ;;  %s2443_s0 = inlined_call_operand.vmem [shape: bf16[2,400,25], index: 0, kind: input, shape index: {}]   ;;  %s2444_s1 = inlined_call_operand.vmem [shape: bf16[2,400,25], index: 1, kind: input, shape index: {}]   ;;  %s2445_s2 = inlined_call_operand.vmem [shape: bf16[2,400,25], index: 2, kind: input, shape index: {}]   ;;  %s2446_s3 = inlined_call_operand.vmem [shape: bf16[2,400,25], index: 3, kind: input, shape index: {}]   ;;  %s2447_s4 = inlined_call_operand.vmem [shape: bf16[32,400], index: 4, kind: input, shape index: {}]   ;;  %s2448_s5 = inlined_call_operand.vmem [shape: f32[32,1], index: 5, kind: input, shape index: {}]   ;;  %s2449_s6 = inlined_call_operand.vmem [shape: bf16[2,32,25], index: 6, kind: output, shape index: {}]  }
   0x1 LB: > { %s1714_s22 = sadd.s32 4294967295, %s2094_s21   ;;  %p1718_p0 = scmp.ge.s32.totalorder %s2094_s21, 1  ;;  %s2094_s21 = sphi %s2132_s21, %s16_s21  }
   0x2   : > { %p242_p1 = scmp.lt.s32.totalorder %s2094_s21, 3 }
   0x4   : > { %p243_p2 = pnand %p1718_p0, %p242_p1 }
   0x5   : > { %p287_p3 = scmp.lt.s32.totalorder (!%p243_p2), %s1714_s22, 1 }
   0x6   : > { %246 = sbr.rel (%p243_p2) target bundleno = 378 (0x17a), region = 44 }
   0xb   : > { %v2143_v0 = vld [vmem:[%s2447_s4 + $0x4] ss:$16 sps:$4 sm:$0xff]   ;;  %v2096_v1 = vmov 0   ;;  %vm559_vm0 = vcmask 130048   ;;  %s2451_s22 = smov (!%p287_p3, %s1714_s22), 1  ;;  %vm1618_vm1 = vcmask 199680  }
   0xc   : > { %615 = vmatprep.subr.bf16.mxu1 %v2096_v1  ;;  %1974 = vset.pattern.permute.xlu0 %v2096_v1  ;;  %v2153_v2 = vld [vmem:[%s2447_s4 + $0xc] ss:$16 sps:$4 sm:$0xff]   ;;  %s2157_s27 = smul.u32 200, %s2451_s22  ;;  %v2208_v28 = vld [vmem:[%s2447_s4] ss:$16 sps:$4 sm:$0xff]   ;;  %s1847_s14 = sshll.u32 %s2451_s22, 4 }
   0xd   : > { %598 = vmatprep.mubr.bf16.mxu0 %v2143_v0  ;;  %1975 = vset.pattern.permute.xlu1 %v2096_v1  ;;  %v2214_v30 = vld [vmem:[%s2447_s4 + $0x24] ss:$16 sps:$4 sm:$0xff]   ;;  %v2220_v31 = vld [vmem:[%s2447_s4 + $0x8] ss:$16 sps:$4 sm:$0xff]   ;;  %v2227_v34 = vld [vmem:[%s2447_s4 + $0x2c] ss:$16 sps:$4 sm:$0xff]   ;;  %s311_s17 = scalar_lea.vmem %s2449_s6, %s1847_s14 }
   0xe   : > { %1758 = vmatprep.mubr.msk.bf16.mxu1 %vm559_vm0, %v2153_v2  ;;  %s2165_s30 = scalar_lea.vmem %s2443_s0, %s2157_s27  ;;  %s2198_s9 = scalar_lea.vmem %s2444_s1, %s2157_s27  ;;  %v2239_v38 = vld [vmem:[%s2447_s4 + $0x20] ss:$16 sps:$4 sm:$0xff]   ;;  %v2250_v42 = vld [vmem:[%s2447_s4 + $0x28] ss:$16 sps:$4 sm:$0xff]  }
   0xf   : > { %v1976_v3 = vld [vmem:[%s2165_s30 + $0x78] sm:$0xff]   ;;  %v1979_v6 = vld [vmem:[%s2165_s30 + $0x70] sm:$0xff]   ;;  %v1982_v9 = vld [vmem:[%s2165_s30 + $0x68] sm:$0xff]   ;;  %s2269_s26 = scalar_lea.vmem %s2445_s2, %s2157_s27 }
  0x10   : > { %v1977_v4 = vld [vmem:[%s2165_s30 + $0xb8] sm:$0xff]   ;;  %1852 = vmatprep.subr.bf16.mxu0 %v1976_v3  ;;  %v1980_v7 = vld [vmem:[%s2165_s30 + $0xb0] sm:$0xff]   ;;  %v1983_v10 = vld [vmem:[%s2165_s30 + $0xa8] sm:$0xff]  }
  0x11   : > { %v1978_v5 = vld [vmem:[%s2165_s30 + $0x38] sm:$0xff]   ;;  %616 = vmatpush1.bf16.msra.mxu1 %v1977_v4  ;;  %v1981_v8 = vld [vmem:[%s2165_s30 + $0x30] sm:$0xff]   ;;  %v1984_v11 = vld [vmem:[%s2165_s30 + $0x28] sm:$0xff]  }
  0x12   : > { %1853 = vmatpush3.bf16.msra.mxu0 %v1978_v5  ;;  %617 = vmatprep.subr.bf16.mxu1 %v2096_v1  ;;  %v1985_v12 = vld [vmem:[%s2165_s30 + $0x60] sm:$0xff]   ;;  %v1988_v15 = vld [vmem:[%s2165_s30 + $0x58] sm:$0xff]   ;;  %v1991_v18 = vld [vmem:[%s2165_s30 + $0x50] sm:$0xff]  }
  0x13   : > { %1854 = vmatprep.subr.bf16.mxu0 %v1979_v6  ;;  %v1986_v13 = vld [vmem:[%s2165_s30 + $0xa0] sm:$0xff]   ;;  %v1989_v16 = vld [vmem:[%s2165_s30 + $0x98] sm:$0xff]   ;;  %v1992_v19 = vld [vmem:[%s2165_s30 + $0x90] sm:$0xff]  }
  0x14   : > { %v1987_v14 = vld [vmem:[%s2165_s30 + $0x20] sm:$0xff]   ;;  %v1990_v17 = vld [vmem:[%s2165_s30 + $0x18] sm:$0xff]   ;;  %v1993_v20 = vld [vmem:[%s2165_s30 + $0x10] sm:$0xff]  }
  0x15   : > { %618 = vmatpush1.bf16.msra.mxu1 %v1980_v7  ;;  %v1994_v21 = vld [vmem:[%s2165_s30 + $0x48] sm:$0xff]   ;;  %v1997_v24 = vld [vmem:[%s2165_s30 + $0x40] sm:$0xff]   ;;  %v2007_v27 = vld [vmem:[%s2198_s9 + $0x78] sm:$0xff]  }
  0x16   : > { %1855 = vmatpush3.bf16.msra.mxu0 %v1981_v8  ;;  %619 = vmatprep.subr.bf16.mxu1 %v2096_v1  ;;  %v1995_v22 = vld [vmem:[%s2165_s30 + $0x88] sm:$0xff]   ;;  %v1998_v25 = vld [vmem:[%s2165_s30 + $0x80] sm:$0xff]   ;;  %v2008_v32 = vld [vmem:[%s2198_s9 + $0x38] sm:$0xff]  }
  0x17   : > { %1856 = vmatprep.subr.bf16.mxu0 %v1982_v9  ;;  %v1996_v23 = vld [vmem:[%s2165_s30 + $0x8] sm:$0xff]   ;;  %v1999_v26 = vld [vmem:[%s2165_s30] sm:$0xff]   ;;  %v2010_v33 = vld [vmem:[%s2198_s9 + $0x70] sm:$0xff]  }
  0x18   : > { %v2003_v29 = vld [vmem:[%s2165_s30 + $0xc0] sm:$0xff]   ;;  %v2009_v35 = vld [vmem:[%s2198_s9 + $0xb8] sm:$0xff]   ;;  %v2011_v36 = vld [vmem:[%s2198_s9 + $0x30] sm:$0xff]   ;;  %s2300_s30 = scalar_lea.vmem %s2446_s3, %s2157_s27 }
  0x19   : > { %620 = vmatpush1.bf16.msra.mxu1 %v1983_v10  ;;  %v2013_v37 = vld [vmem:[%s2198_s9 + $0x68] sm:$0xff]   ;;  %v2012_v39 = vld [vmem:[%s2198_s9 + $0xb0] sm:$0xff]   ;;  %v2016_v41 = vld [vmem:[%s2198_s9 + $0x60] sm:$0xff]  }
  0x1a   : > { %1857 = vmatpush3.bf16.msra.mxu0 %v1984_v11  ;;  %621 = vmatprep.subr.bf16.mxu1 %v2096_v1  ;;  %v2014_v40 = vld [vmem:[%s2198_s9 + $0x28] sm:$0xff]   ;;  %v2017_v44 = vld [vmem:[%s2198_s9 + $0x20] sm:$0xff]   ;;  %v2019_v45 = vld [vmem:[%s2198_s9 + $0x58] sm:$0xff]  }
  0x1b   : > { %1858 = vmatprep.subr.bf16.mxu0 %v1985_v12  ;;  %v2015_v43 = vld [vmem:[%s2198_s9 + $0xa8] sm:$0xff]   ;;  %v2018_v46 = vld [vmem:[%s2198_s9 + $0xa0] sm:$0xff]   ;;  %v2020_v47 = vld [vmem:[%s2198_s9 + $0x18] sm:$0xff]  }
  0x1c   : > { %v2024_v48 = vld [vmem:[%s2198_s9 + $0x50] sm:$0xff]   ;;  %v2021_v49 = vld [vmem:[%s2198_s9 + $0x98] sm:$0xff]   ;;  %v2031_v51 = vld [vmem:[%s2198_s9 + $0x48] sm:$0xff]  }
  0x1d   : > { %622 = vmatpush1.bf16.msra.mxu1 %v1986_v13  ;;  %v2026_v50 = vld [vmem:[%s2198_s9 + $0x10] sm:$0xff]   ;;  %v2032_v53 = vld [vmem:[%s2198_s9 + $0x8] sm:$0xff]   ;;  %v2034_v54 = vld [vmem:[%s2198_s9 + $0x40] sm:$0xff]  }
  0x1e   : > { %1859 = vmatpush3.bf16.msra.mxu0 %v1987_v14  ;;  %623 = vmatprep.subr.bf16.mxu1 %v2096_v1  ;;  %v2027_v52 = vld [vmem:[%s2198_s9 + $0x90] sm:$0xff]   ;;  %v2033_v55 = vld [vmem:[%s2198_s9 + $0x88] sm:$0xff]   ;;  %v2035_v56 = vld [vmem:[%s2198_s9] sm:$0xff]  }
  0x1f   : > { %1860 = vmatprep.subr.bf16.mxu0 %v1988_v15  ;;  %v2038_v57 = vld [vmem:[%s2269_s26 + $0x78] sm:$0xff]   ;;  %v2036_v58 = vld [vmem:[%s2198_s9 + $0x80] sm:$0xff]   ;;  %v2041_v60 = vld [vmem:[%s2269_s26 + $0x70] sm:$0xff]  }
  0x20   : > { %v2039_v59 = vld [vmem:[%s2269_s26 + $0x38] sm:$0xff]   ;;  %v2037_v61 = vld [vmem:[%s2198_s9 + $0xc0] sm:$0xff]   ;;  %v2042_v62 = vld [vmem:[%s2269_s26 + $0x30] sm:$0xff]  }
  0x21   : > { %624 = vmatpush1.bf16.msra.mxu1 %v1989_v16  ;;  %v2044_v63 = vld [vmem:[%s2269_s26 + $0x68] sm:$0xff]   ;;  %v2040_v3 = vld [vmem:[%s2269_s26 + $0xb8] sm:$0xff]   ;;  %v2047_v5 = vld [vmem:[%s2269_s26 + $0x60] sm:$0xff]  }
  0x22   : > { %1861 = vmatpush3.bf16.msra.mxu0 %v1990_v17  ;;  %625 = vmatprep.subr.bf16.mxu1 %v2096_v1  ;;  %v2045_v4 = vld [vmem:[%s2269_s26 + $0x28] sm:$0xff]   ;;  %v2043_v6 = vld [vmem:[%s2269_s26 + $0xb0] sm:$0xff]   ;;  %v2048_v7 = vld [vmem:[%s2269_s26 + $0x20] sm:$0xff]  }
  0x23   : > { %1862 = vmatprep.subr.bf16.mxu0 %v1991_v18  ;;  %v2050_v8 = vld [vmem:[%s2269_s26 + $0x58] sm:$0xff]   ;;  %v2046_v9 = vld [vmem:[%s2269_s26 + $0xa8] sm:$0xff]   ;;  %v2053_v11 = vld [vmem:[%s2269_s26 + $0x50] sm:$0xff]  }
  0x24   : > { %v2051_v10 = vld [vmem:[%s2269_s26 + $0x18] sm:$0xff]   ;;  %v2049_v12 = vld [vmem:[%s2269_s26 + $0xa0] sm:$0xff]   ;;  %v2054_v13 = vld [vmem:[%s2269_s26 + $0x10] sm:$0xff]  }
  0x25   : > { %626 = vmatpush1.bf16.msra.mxu1 %v1992_v19  ;;  %v2056_v14 = vld [vmem:[%s2269_s26 + $0x48] sm:$0xff]   ;;  %v2052_v15 = vld [vmem:[%s2269_s26 + $0x98] sm:$0xff]   ;;  %v2059_v17 = vld [vmem:[%s2269_s26 + $0x40] sm:$0xff]  }
  0x26   : > { %1863 = vmatpush3.bf16.msra.mxu0 %v1993_v20  ;;  %627 = vmatprep.subr.bf16.mxu1 %v2096_v1  ;;  %v2057_v16 = vld [vmem:[%s2269_s26 + $0x8] sm:$0xff]   ;;  %v2055_v18 = vld [vmem:[%s2269_s26 + $0x90] sm:$0xff]   ;;  %v2060_v19 = vld [vmem:[%s2269_s26] sm:$0xff]  }
  0x27   : > { %1864 = vmatprep.subr.bf16.mxu0 %v1994_v21  ;;  %v2062_v20 = vld [vmem:[%s2300_s30 + $0x78] sm:$0xff]   ;;  %v2058_v21 = vld [vmem:[%s2269_s26 + $0x88] sm:$0xff]  }
  0x29   : > { %628 = vmatpush1.bf16.msra.mxu1 %v1995_v22  ;;  %v2063_v22 = vld [vmem:[%s2300_s30 + $0x38] sm:$0xff]  }
  0x2a   : > { %1865 = vmatpush3.bf16.msra.mxu0 %v1996_v23  ;;  %629 = vmatprep.subr.bf16.mxu1 %v2096_v1  ;;  %v2065_v23 = vld [vmem:[%s2300_s30 + $0x70] sm:$0xff]  }
  0x2b   : > { %1866 = vmatprep.subr.bf16.mxu0 %v1997_v24  ;;  %v2061_v24 = vld [vmem:[%s2269_s26 + $0x80] sm:$0xff]  }
  0x2d   : > { %630 = vmatpush1.bf16.msra.mxu1 %v1998_v25  ;;  %v1570_v25 = vld [vmem:[%s2448_s5] sm:$0xff] }
  0x2e   : > { %1867 = vmatpush3.bf16.msra.mxu0 %v1999_v26  ;;  %645 = vmatprep.subr.bf16.mxu1 %v2096_v1  ;;  %v1572_v26 = vld [vmem:[%s2448_s5 + $0x10] sm:$0xff] }
  0x2f   : > { %1880 = vmatprep.subr.bf16.mxu0 %v2007_v27  ;;  %v2066_v27 = vld [vmem:[%s2300_s30 + $0x30] sm:$0xff]   ;;  %1576 = vperm.xlu0 %1974, %v1570_v25  }
  0x30   : > { %1586 = vperm.xlu1 %1975, %v1572_v26  }
  0x31   : > { %599 = vmatmul.mubr.bf16.vlgmr.msra.gmra.mxu0 %v2208_v28  ;;  %646 = vmatpush2.bf16.msra.mxu1 %v2003_v29  ;;  %v2068_v29 = vld [vmem:[%s2300_s30 + $0x68] sm:$0xff]  }
  0x32   : > { %913 = vmatprep.subr.bf16.mxu1 %v2096_v1  ;;  %1881 = vmatpush3.bf16.msra.mxu0 %v2008_v32  ;;  %v2064_v32 = vld [vmem:[%s2269_s26 + $0xc0] sm:$0xff]  }
  0x33   : > { %1882 = vmatprep.subr.bf16.mxu0 %v2010_v33  ;;  %606 = vmatprep.mubr.bf16.mxu0 %v2214_v30  ;;  %v1571_v33 = vld [vmem:[%s2448_s5 + $0x8] sm:$0xff] }
  0x34   : > { %648 = vmatmul.mubr.bf16.vlgmr.msra.gmra.mxu1 %v2220_v31  ;;  %1581 = vperm.xlu0 %1974, %v1571_v33  }
  0x35   : > { %914 = vmatpush1.bf16.msra.mxu1 %v2009_v35  ;;  %1759 = vmatprep.mubr.msk.bf16.mxu1 %vm559_vm0, %v2227_v34  ;;  %v1573_v35 = vld [vmem:[%s2448_s5 + $0x18] sm:$0xff] }
  0x36   : > { %915 = vmatprep.subr.bf16.mxu1 %v2096_v1  ;;  %1883 = vmatpush3.bf16.msra.mxu0 %v2011_v36  ;;  %v2069_v36 = vld [vmem:[%s2300_s30 + $0x28] sm:$0xff]  }
  0x37   : > { %1884 = vmatprep.subr.bf16.mxu0 %v2013_v37  ;;  %v2071_v37 = vld [vmem:[%s2300_s30 + $0x60] sm:$0xff]   ;;  %1591 = vperm.xlu1 %1975, %v1573_v35  }
  0x39   : > { %916 = vmatpush1.bf16.msra.mxu1 %v2012_v39  ;;  %607 = vmatmul.mubr.bf16.gmra.mxu0 %v2239_v38  ;;  %v2067_v39 = vld [vmem:[%s2300_s30 + $0xb8] sm:$0xff]  }
  0x3a   : > { %917 = vmatprep.subr.bf16.mxu1 %v2096_v1  ;;  %1885 = vmatpush3.bf16.msra.mxu0 %v2014_v40  ;;  %v2072_v40 = vld [vmem:[%s2300_s30 + $0x20] sm:$0xff]  }
  0x3b   : > { %1886 = vmatprep.subr.bf16.mxu0 %v2016_v41  ;;  %896 = vmatprep.mubr.bf16.mxu0 %v2143_v0  ;;  %v2074_v41 = vld [vmem:[%s2300_s30 + $0x58] sm:$0xff]  }
  0x3c   : > { %656 = vmatmul.mubr.bf16.gmra.mxu1 %v2250_v42 }
  0x3d   : > { %918 = vmatpush1.bf16.msra.mxu1 %v2015_v43  ;;  %1785 = vmatprep.mubr.msk.bf16.mxu1 %vm559_vm0, %v2153_v2  ;;  %v2070_v43 = vld [vmem:[%s2300_s30 + $0xb0] sm:$0xff]  }
  0x3e   : > { %919 = vmatprep.subr.bf16.mxu1 %v2096_v1  ;;  %1887 = vmatpush3.bf16.msra.mxu0 %v2017_v44  ;;  %v2075_v44 = vld [vmem:[%s2300_s30 + $0x18] sm:$0xff]  }
  0x3f   : > { %1888 = vmatprep.subr.bf16.mxu0 %v2019_v45  ;;  %v2077_v45 = vld [vmem:[%s2300_s30 + $0x50] sm:$0xff]  }
  0x41   : > { %920 = vmatpush1.bf16.msra.mxu1 %v2018_v46  ;;  %v2078_v46 = vld [vmem:[%s2300_s30 + $0x10] sm:$0xff]  }
  0x42   : > { %921 = vmatprep.subr.bf16.mxu1 %v2096_v1  ;;  %1889 = vmatpush3.bf16.msra.mxu0 %v2020_v47  ;;  %v2080_v47 = vld [vmem:[%s2300_s30 + $0x48] sm:$0xff]  }
  0x43   : > { %1890 = vmatprep.subr.bf16.mxu0 %v2024_v48  ;;  %v2076_v48 = vld [vmem:[%s2300_s30 + $0xa0] sm:$0xff]  }
  0x45   : > { %922 = vmatpush1.bf16.msra.mxu1 %v2021_v49  ;;  %v2081_v49 = vld [vmem:[%s2300_s30 + $0x8] sm:$0xff]  }
  0x46   : > { %923 = vmatprep.subr.bf16.mxu1 %v2096_v1  ;;  %1891 = vmatpush3.bf16.msra.mxu0 %v2026_v50  ;;  %v2083_v50 = vld [vmem:[%s2300_s30 + $0x40] sm:$0xff]  }
  0x47   : > { %1892 = vmatprep.subr.bf16.mxu0 %v2031_v51  ;;  %v2079_v51 = vld [vmem:[%s2300_s30 + $0x98] sm:$0xff]  }
  0x49   : > { %924 = vmatpush1.bf16.msra.mxu1 %v2027_v52  ;;  %v2084_v52 = vld [vmem:[%s2300_s30] sm:$0xff]  }
  0x4a   : > { %925 = vmatprep.subr.bf16.mxu1 %v2096_v1  ;;  %1893 = vmatpush3.bf16.msra.mxu0 %v2032_v53  ;;  %v2082_v53 = vld [vmem:[%s2300_s30 + $0x90] sm:$0xff]  }
  0x4b   : > { %1894 = vmatprep.subr.bf16.mxu0 %v2034_v54  ;;  %v2086_v54 = vld [vmem:[%s2300_s30 + $0x80] sm:$0xff]  }
  0x4d   : > { %926 = vmatpush1.bf16.msra.mxu1 %v2033_v55  ;;  %v2087_v55 = vld [vmem:[%s2300_s30 + $0xc0] sm:$0xff]  }
  0x4e   : > { %927 = vmatprep.subr.bf16.mxu1 %v2096_v1  ;;  %1895 = vmatpush3.bf16.msra.mxu0 %v2035_v56 }
  0x4f   : > { %1908 = vmatprep.subr.bf16.mxu0 %v2038_v57 }
  0x51   : > { %928 = vmatpush1.bf16.msra.mxu1 %v2036_v58  ;;  %897 = vmatmul.mubr.bf16.vlgmr.msra.gmra.mxu0 %v2208_v28 }
  0x52   : > { %943 = vmatprep.subr.bf16.mxu1 %v2096_v1  ;;  %1909 = vmatpush3.bf16.msra.mxu0 %v2039_v59 }
  0x53   : > { %1910 = vmatprep.subr.bf16.mxu0 %v2041_v60  ;;  %904 = vmatprep.mubr.bf16.mxu0 %v2214_v30 }
  0x55   : > { %944 = vmatpush2.bf16.msra.mxu1 %v2037_v61 }
  0x56   : > { %1215 = vmatprep.subr.bf16.mxu1 %v2096_v1  ;;  %1911 = vmatpush3.bf16.msra.mxu0 %v2042_v62 }
  0x57   : > { %1912 = vmatprep.subr.bf16.mxu0 %v2044_v63 }
  0x58   : > { %946 = vmatmul.mubr.bf16.vlgmr.msra.gmra.mxu1 %v2220_v31 }
  0x59   : > { %1216 = vmatpush1.bf16.msra.mxu1 %v2040_v3  ;;  %905 = vmatmul.mubr.bf16.gmra.mxu0 %v2239_v38 }
  0x5a   : > { %1217 = vmatprep.subr.bf16.mxu1 %v2096_v1  ;;  %1786 = vmatprep.mubr.msk.bf16.mxu1 %vm559_vm0, %v2227_v34 }
  0x5b   : > { %1913 = vmatpush3.bf16.msra.mxu0 %v2045_v4  ;;  %1198 = vmatprep.mubr.bf16.mxu0 %v2143_v0 }
  0x5c   : > { %1914 = vmatprep.subr.bf16.mxu0 %v2047_v5 }
  0x5d   : > { %1218 = vmatpush1.bf16.msra.mxu1 %v2043_v6 }
  0x5e   : > { %1219 = vmatprep.subr.bf16.mxu1 %v2096_v1 }
  0x5f   : > { %1915 = vmatpush3.bf16.msra.mxu0 %v2048_v7 }
  0x60   : > { %954 = vmatmul.mubr.bf16.gmra.mxu1 %v2250_v42  ;;  %1916 = vmatprep.subr.bf16.mxu0 %v2050_v8 }
  0x61   : > { %1220 = vmatpush1.bf16.msra.mxu1 %v2046_v9  ;;  %1812 = vmatprep.mubr.msk.bf16.mxu1 %vm559_vm0, %v2153_v2 }
  0x62   : > { %1221 = vmatprep.subr.bf16.mxu1 %v2096_v1 }
  0x63   : > { %1917 = vmatpush3.bf16.msra.mxu0 %v2051_v10 }
  0x64   : > { %1918 = vmatprep.subr.bf16.mxu0 %v2053_v11 }
  0x65   : > { %1222 = vmatpush1.bf16.msra.mxu1 %v2049_v12 }
  0x66   : > { %1223 = vmatprep.subr.bf16.mxu1 %v2096_v1 }
  0x67   : > { %1919 = vmatpush3.bf16.msra.mxu0 %v2054_v13 }
  0x68   : > { %1920 = vmatprep.subr.bf16.mxu0 %v2056_v14 }
  0x69   : > { %1224 = vmatpush1.bf16.msra.mxu1 %v2052_v15 }
  0x6a   : > { %1225 = vmatprep.subr.bf16.mxu1 %v2096_v1 }
  0x6b   : > { %1921 = vmatpush3.bf16.msra.mxu0 %v2057_v16 }
  0x6c   : > { %1922 = vmatprep.subr.bf16.mxu0 %v2059_v17 }
  0x6d   : > { %1226 = vmatpush1.bf16.msra.mxu1 %v2055_v18 }
  0x6e   : > { %1227 = vmatprep.subr.bf16.mxu1 %v2096_v1 }
  0x6f   : > { %1923 = vmatpush3.bf16.msra.mxu0 %v2060_v19 }
  0x70   : > { %1936 = vmatprep.subr.bf16.mxu0 %v2062_v20 }
  0x71   : > { %1228 = vmatpush1.bf16.msra.mxu1 %v2058_v21 }
  0x72   : > { %1229 = vmatprep.subr.bf16.mxu1 %v2096_v1  ;;  %1199 = vmatmul.mubr.bf16.vlgmr.msra.gmra.mxu0 %v2208_v28 }
  0x73   : > { %1937 = vmatpush3.bf16.msra.mxu0 %v2063_v22  ;;  %1206 = vmatprep.mubr.bf16.mxu0 %v2214_v30 }
  0x74   : > { %1938 = vmatprep.subr.bf16.mxu0 %v2065_v23 }
  0x75   : > { %1230 = vmatpush1.bf16.msra.mxu1 %v2061_v24 }
  0x76   : > { %1245 = vmatprep.subr.bf16.mxu1 %v2096_v1 }
  0x77   : > { %1939 = vmatpush3.bf16.msra.mxu0 %v2066_v27 }
  0x78   : > { %1940 = vmatprep.subr.bf16.mxu0 %v2068_v29 }
  0x79   : > { %1246 = vmatpush2.bf16.msra.mxu1 %v2064_v32 }
  0x7a   : > { %1513 = vmatprep.subr.bf16.mxu1 %v2096_v1  ;;  %1207 = vmatmul.mubr.bf16.gmra.mxu0 %v2239_v38 }
  0x7b   : > { %1941 = vmatpush3.bf16.msra.mxu0 %v2069_v36  ;;  %1496 = vmatprep.mubr.bf16.mxu0 %v2143_v0  ;;  %v2073_v0 = vld [vmem:[%s2300_s30 + $0xa8] sm:$0xff]  }
  0x7c   : > { %1248 = vmatmul.mubr.bf16.vlgmr.msra.gmra.mxu1 %v2220_v31  ;;  %1942 = vmatprep.subr.bf16.mxu0 %v2071_v37 }
  0x7d   : > { %1514 = vmatpush1.bf16.msra.mxu1 %v2067_v39  ;;  %1813 = vmatprep.mubr.msk.bf16.mxu1 %vm559_vm0, %v2227_v34 }
  0x7e   : > { %1515 = vmatprep.subr.bf16.mxu1 %v2096_v1 }
  0x7f   : > { %1943 = vmatpush3.bf16.msra.mxu0 %v2072_v40 }
  0x80   : > { %1944 = vmatprep.subr.bf16.mxu0 %v2074_v41 }
  0x81   : > { %1516 = vmatpush1.bf16.msra.mxu1 %v2070_v43 }
  0x82   : > { %1517 = vmatprep.subr.bf16.mxu1 %v2096_v1 }
  0x83   : > { %1945 = vmatpush3.bf16.msra.mxu0 %v2075_v44 }
  0x84   : > { %1946 = vmatprep.subr.bf16.mxu0 %v2077_v45  ;;  %1256 = vmatmul.mubr.bf16.gmra.mxu1 %v2250_v42 }
  0x85   : > { %1518 = vmatpush1.bf16.msra.mxu1 %v2073_v0  ;;  %1839 = vmatprep.mubr.msk.bf16.mxu1 %vm559_vm0, %v2153_v2  ;;  %v2085_v2 = vld [vmem:[%s2300_s30 + $0x88] sm:$0xff]  }
  0x86   : > { %1519 = vmatprep.subr.bf16.mxu1 %v2096_v1 }
  0x87   : > { %1947 = vmatpush3.bf16.msra.mxu0 %v2078_v46 }
  0x88   : > { %1948 = vmatprep.subr.bf16.mxu0 %v2080_v47 }
  0x89   : > { %1520 = vmatpush1.bf16.msra.mxu1 %v2076_v48 }
  0x8a   : > { %1521 = vmatprep.subr.bf16.mxu1 %v2096_v1 }
  0x8b   : > { %1949 = vmatpush3.bf16.msra.mxu0 %v2081_v49 }
  0x8c   : > { %1950 = vmatprep.subr.bf16.mxu0 %v2083_v50 }
  0x8d   : > { %1522 = vmatpush1.bf16.msra.mxu1 %v2079_v51 }
  0x8e   : > { %1523 = vmatprep.subr.bf16.mxu1 %v2096_v1 }
  0x8f   : > { %1951 = vmatpush3.bf16.msra.mxu0 %v2084_v52 }
  0x91   : > { %1524 = vmatpush1.bf16.msra.mxu1 %v2082_v53 }
  0x92   : > { %1525 = vmatprep.subr.bf16.mxu1 %v2096_v1  ;;  %1497 = vmatmul.mubr.bf16.vlgmr.msra.gmra.mxu0 %v2208_v28 }
  0x93   : > { %1504 = vmatprep.mubr.bf16.mxu0 %v2214_v30 }
  0x95   : > { %1526 = vmatpush1.bf16.msra.mxu1 %v2085_v2 }
  0x96   : > { %1527 = vmatprep.subr.bf16.mxu1 %v2096_v1 }
  0x99   : > { %1528 = vmatpush1.bf16.msra.mxu1 %v2086_v54 }
  0x9a   : > { %1543 = vmatprep.subr.bf16.mxu1 %v2096_v1  ;;  %1505 = vmatmul.mubr.bf16.gmra.mxu0 %v2239_v38 }
  0x9d   : > { %1544 = vmatpush2.bf16.msra.mxu1 %v2087_v55 }
  0xa0   : > { %1546 = vmatmul.mubr.bf16.vlgmr.msra.gmra.mxu1 %v2220_v31 }
  0xa1   : > { %1840 = vmatprep.mubr.msk.bf16.mxu1 %vm559_vm0, %v2227_v34 }
  0xa8   : > { %1554 = vmatmul.mubr.bf16.gmra.mxu1 %v2250_v42 }
  0xf1   : > { %v1868_v30 = vpop.f32.mrf.mxu0 }
  0xf3   : > { %v1869_v58 = vpop.f32.mrf.mxu0 }
  0xf4   : > { %v649_v28 = vpop.f32.mrf.mxu1  ;;  %v1870_v7 = vadd.f32 %v1869_v58, %v1868_v30 }
  0xf5   : > { %v1871_v61 = vpop.f32.mrf.mxu0 }
  0xf6   : > { %v651_v56 = vpop.f32.mrf.mxu1  ;;  %v2399_v11 = vadd.f32 %v1870_v7, %v649_v28 }
  0xf7   : > { %v1872_v63 = vpop.f32.mrf.mxu0 }
  0xf8   : > { %v652_v57 = vpop.f32.mrf.mxu1  ;;  %v1873_v12 = vadd.f32 %v1872_v63, %v1871_v61 }
  0xf9   : > { %v1874_v3 = vpop.f32.mrf.mxu0 }
  0xfa   : > { %v654_v59 = vpop.f32.mrf.mxu1  ;;  %v2405_v20 = vadd.f32 %v1873_v12, %v652_v57 }
  0xfb   : > { %v1875_v4 = vpop.f32.mrf.mxu0 }
  0xfc   : > { %v657_v60 = vpop.f32.mrf.mxu1  ;;  %v1876_v21 = vadd.f32 %v1875_v4, %v1874_v3 }
  0xfd   : > { %v1877_v31 = vpop.f32.mrf.mxu0 }
  0xfe   : > { %v659_v62 = vpop.f32.mrf.mxu1  ;;  %v2411_v32 = vadd.f32 %v1876_v21, %v657_v60 }
  0xff   : > { %v1878_v5 = vpop.f32.mrf.mxu0 }
 0x100   : > { %v660_v1 = vpop.f32.mrf.mxu1  ;;  %v1879_v33 = vadd.f32 %v1878_v5, %v1877_v31 }
 0x102   : > { %v662_v38 = vpop.f32.mrf.mxu1  ;;  %v2417_v41 = vadd.f32 %v1879_v33, %v660_v1 }
 0x111   : > { %v1896_v6 = vpop.f32.mrf.mxu0 }
 0x113   : > { %v1897_v34 = vpop.f32.mrf.mxu0 }
 0x114   : > { %v1898_v42 = vadd.f32 %v1897_v34, %v1896_v6  ;;  %v1577_v6 = vpop.permute.xlu0 %1576 }
 0x115   : > { %v1899_v8 = vpop.f32.mrf.mxu0 }
 0x117   : > { %v1900_v9 = vpop.f32.mrf.mxu0 }
 0x118   : > { %v947_v10 = vpop.f32.mrf.mxu1  ;;  %v1901_v14 = vadd.f32 %v1900_v9, %v1899_v8 }
 0x119   : > { %v2401_v13 = vadd.f32 %v1898_v42, %v947_v10  ;;  %v1902_v15 = vpop.f32.mrf.mxu0 }
 0x11a   : > { %v949_v16 = vpop.f32.mrf.mxu1 }
 0x11b   : > { %v962_v17 = vmax.f32 %v2399_v11, %v2401_v13  ;;  %v1903_v18 = vpop.f32.mrf.mxu0 }
 0x11c   : > { %v950_v19 = vpop.f32.mrf.mxu1  ;;  %v1904_v23 = vadd.f32 %v1903_v18, %v1902_v15 }
 0x11d   : > { %v2407_v22 = vadd.f32 %v1901_v14, %v950_v19  ;;  %v1905_v24 = vpop.f32.mrf.mxu0  ;;  %v1582_v19 = vpop.permute.xlu0 %1581 }
 0x11e   : > { %v952_v25 = vpop.f32.mrf.mxu1 }
 0x11f   : > { %v963_v26 = vmax.f32 %v2405_v20, %v2407_v22  ;;  %v1906_v27 = vpop.f32.mrf.mxu0 }
 0x120   : > { %v955_v29 = vpop.f32.mrf.mxu1  ;;  %v1907_v36 = vadd.f32 %v1906_v27, %v1905_v24 }
 0x121   : > { %v2413_v35 = vadd.f32 %v1904_v23, %v955_v29 }
 0x122   : > { %v957_v37 = vpop.f32.mrf.mxu1 }
 0x123   : > { %v964_v39 = vmax.f32 %v2411_v32, %v2413_v35 }
 0x124   : > { %v958_v40 = vpop.f32.mrf.mxu1 }
 0x125   : > { %v2419_v43 = vadd.f32 %v1907_v36, %v958_v40 }
 0x126   : > { %v960_v44 = vpop.f32.mrf.mxu1 }
 0x127   : > { %v965_v45 = vmax.f32 %v2417_v41, %v2419_v43 }
 0x132   : > { %v1924_v0 = vpop.f32.mrf.mxu0 }
 0x134   : > { %v1925_v46 = vpop.f32.mrf.mxu0 }
 0x135   : > { %v1926_v1 = vadd.f32 %v1925_v46, %v1924_v0  ;;  %v1587_v0 = vpop.permute.xlu1 %1586 }
 0x136   : > { %v1927_v47 = vpop.f32.mrf.mxu0 }
 0x138   : > { %v1928_v50 = vpop.f32.mrf.mxu0 }
 0x139   : > { %v1929_v31 = vadd.f32 %v1928_v50, %v1927_v47 }
 0x13a   : > { %v1930_v53 = vpop.f32.mrf.mxu0 }
 0x13c   : > { %v1249_v48 = vpop.f32.mrf.mxu1  ;;  %v1931_v54 = vpop.f32.mrf.mxu0 }
 0x13d   : > { %v1250_v4 = vadd.f32 %v1926_v1, %v1249_v48  ;;  %v1932_v11 = vadd.f32 %v1931_v54, %v1930_v53 }
 0x13e   : > { %v1251_v49 = vpop.f32.mrf.mxu1  ;;  %v1933_v30 = vpop.f32.mrf.mxu0 }
 0x140   : > { %v1252_v51 = vpop.f32.mrf.mxu1  ;;  %v1934_v57 = vpop.f32.mrf.mxu0 }
 0x141   : > { %v1253_v10 = vadd.f32 %v1929_v31, %v1252_v51  ;;  %v1935_v21 = vadd.f32 %v1934_v57, %v1933_v30 }
 0x142   : > { %v1254_v52 = vpop.f32.mrf.mxu1 }
 0x144   : > { %v1257_v2 = vpop.f32.mrf.mxu1 }
 0x145   : > { %v1258_v25 = vadd.f32 %v1932_v11, %v1257_v2  ;;  %v1592_v2 = vpop.permute.xlu1 %1591 }
 0x146   : > { %v1259_v55 = vpop.f32.mrf.mxu1 }
 0x148   : > { %v1260_v28 = vpop.f32.mrf.mxu1 }
 0x149   : > { %v1261_v47 = vadd.f32 %v1935_v21, %v1260_v28 }
 0x14a   : > { %v1262_v56 = vpop.f32.mrf.mxu1 }
 0x152   : > { %v1952_v58 = vpop.f32.mrf.mxu0 }
 0x154   : > { %v1953_v59 = vpop.f32.mrf.mxu0 }
 0x155   : > { %v1954_v63 = vadd.f32 %v1953_v59, %v1952_v58 }
 0x156   : > { %v1955_v60 = vpop.f32.mrf.mxu0 }
 0x158   : > { %v1956_v61 = vpop.f32.mrf.mxu0 }
 0x159   : > { %v1957_v7 = vadd.f32 %v1956_v61, %v1955_v60 }
 0x15a   : > { %v1958_v62 = vpop.f32.mrf.mxu0 }
 0x15c   : > { %v1959_v38 = vpop.f32.mrf.mxu0 }
 0x15d   : > { %v1960_v15 = vadd.f32 %v1959_v38, %v1958_v62 }
 0x15e   : > { %v1961_v8 = vpop.f32.mrf.mxu0 }
 0x160   : > { %v1547_v3 = vpop.f32.mrf.mxu1  ;;  %v1962_v23 = vpop.f32.mrf.mxu0 }
 0x161   : > { %v1548_v5 = vadd.f32 %v1954_v63, %v1547_v3  ;;  %v1963_v36 = vadd.f32 %v1962_v23, %v1961_v8 }
 0x162   : > { %v1549_v34 = vpop.f32.mrf.mxu1 }
 0x163   : > { %v1562_v42 = vmax.f32 %v1250_v4, %v1548_v5 }
 0x164   : > { %v1550_v9 = vpop.f32.mrf.mxu1 }
 0x165   : > { %v1551_v12 = vadd.f32 %v1957_v7, %v1550_v9  ;;  %v1566_v13 = vmax.f32 %v962_v17, %v1562_v42 }
 0x166   : > { %v1552_v14 = vpop.f32.mrf.mxu1 }
 0x167   : > { %v1563_v16 = vmax.f32 %v1253_v10, %v1551_v12  ;;  %v1594_v18 = vadd.f32 %v1577_v6, %v1566_v13 }
 0x168   : > { %v1555_v24 = vpop.f32.mrf.mxu1 }
 0x169   : > { %v1598_v27 = vmax.f32 %v1594_v18, 0.0  ;;  %v1556_v29 = vadd.f32 %v1960_v15, %v1555_v24  ;;  %v1567_v33 = vmax.f32 %v963_v26, %v1563_v16 }
 0x16a   : > { %v1557_v17 = vpop.f32.mrf.mxu1 }
 0x16b   : > { %v1848_v37 = vpack.c.bf16 %v1598_v27, %v1598_v27  ;;  %v1564_v40 = vmax.f32 %v1258_v25, %v1556_v29  ;;  %v1595_v44 = vadd.f32 %v1582_v19, %v1567_v33 }
 0x16c   : > { %v1558_v46 = vpop.f32.mrf.mxu1 }
 0x16d   : > { %1619 = vst.msk [vmem:[%s311_s17] sm:$0xf] %vm1618_vm1, %v1848_v37  ;;  %v1568_v20 = vmax.f32 %v964_v39, %v1564_v40  ;;  %v1599_v22 = vmax.f32 %v1595_v44, 0.0  ;;  %v1559_v26 = vadd.f32 %v1963_v36, %v1558_v46 }
 0x16e   : > { %v1560_v48 = vpop.f32.mrf.mxu1 }
 0x16f   : > { %v1596_v49 = vadd.f32 %v1587_v0, %v1568_v20  ;;  %v1849_v50 = vpack.c.bf16 %v1599_v22, %v1599_v22  ;;  %v1565_v51 = vmax.f32 %v1261_v47, %v1559_v26 }
 0x171   : > { %v1600_v52 = vmax.f32 %v1596_v49, 0.0  ;;  %1620 = vst.msk [vmem:[%s311_s17 + $0x4] sm:$0xf] %vm1618_vm1, %v1849_v50  ;;  %v1569_v53 = vmax.f32 %v965_v45, %v1565_v51 }
 0x173   : > { %v1850_v54 = vpack.c.bf16 %v1600_v52, %v1600_v52  ;;  %v1597_v55 = vadd.f32 %v1592_v2, %v1569_v53 }
 0x175   : > { %1621 = vst.msk [vmem:[%s311_s17 + $0x8] sm:$0xf] %vm1618_vm1, %v1850_v54  ;;  %v1601_v32 = vmax.f32 %v1597_v55, 0.0 }
 0x177   : > { %v1851_v35 = vpack.c.bf16 %v1601_v32, %v1601_v32 }
 0x179   : > { %1622 = vst.msk [vmem:[%s311_s17 + $0xc] sm:$0xf] %vm1618_vm1, %v1851_v35 }
 0x17a PF: > { %s16_s21 = sadd.s32 1, %s2094_s21  }
 0x17b   : > { %p13_p4 = scmp.ge.s32.totalorder %s16_s21, 4  }
 0x17d   :  { %15 = sbr.rel (!%p13_p4) target bundleno = 1 (0x1), region = 83 }

// kernel: cnn_forward.7
= control target key start
LH: loop header
LB: loop body
LE: loop exit
PB: predicated region body
PF: predicated region fallthrough
CT: control target
= control target key end

     0   :  { %v141_v29 = vlaneseq  ;;  %v1179_v33 = vmov 1966171168   ;;  %v1180_v40 = vmov 0.0   ;;  %vm1181_vm0 = vmmov 0   ;;  %s1452_s0 = inlined_call_operand.vmem [shape: bf16[2,800], index: 0, kind: input, shape index: {}]   ;;  %s1453_s1 = inlined_call_operand.vmem [shape: bf16[800,120], index: 1, kind: input, shape index: {}]   ;;  %s1454_s2 = inlined_call_operand.vmem [shape: f32[1,120], index: 2, kind: input, shape index: {}]   ;;  %s1455_s3 = inlined_call_operand.vmem [shape: bf16[120,84], index: 3, kind: input, shape index: {}]   ;;  %s1456_s4 = inlined_call_operand.vmem [shape: f32[1,84], index: 4, kind: input, shape index: {}]   ;;  %s1457_s5 = inlined_call_operand.vmem [shape: bf16[84,2], index: 5, kind: input, shape index: {}]   ;;  %s1458_s6 = inlined_call_operand.vmem [shape: f32[1,2], index: 6, kind: input, shape index: {}]   ;;  %s1459_s7 = inlined_call_operand.hbm [shape: f32[2,2], index: 7, kind: output, shape index: {}]  }
   0x1   :  { %v1092_v0 = vld [vmem:[%s1453_s1 + $0x78] sm:$0xff]   ;;  %v1096_v4 = vld [vmem:[%s1453_s1 + $0x70] sm:$0xff]   ;;  %v1100_v8 = vld [vmem:[%s1453_s1 + $0x68] sm:$0xff]   ;;  %v139_v34 = vunpack.c.l.s4 %v1179_v33  ;;  %vm491_vm1 = vcmask 261120  }
   0x2   :  { %v1093_v1 = vld [vmem:[%s1453_s1 + $0x38] sm:$0xff]   ;;  %959 = vmatprep.subr.bf16.mxu0 %v1092_v0  ;;  %v1097_v5 = vld [vmem:[%s1453_s1 + $0x30] sm:$0xff]   ;;  %v1101_v9 = vld [vmem:[%s1453_s1 + $0x28] sm:$0xff]   ;;  %v142_v35 = vshrl.u32 %v141_v29, 7 }
   0x3   :  { %v1094_v2 = vld [vmem:[%s1453_s1 + $0xf8] sm:$0xff]   ;;  %960 = vmatpush3.bf16.msra.mxu0 %v1093_v1  ;;  %v1098_v6 = vld [vmem:[%s1453_s1 + $0xf0] sm:$0xff]   ;;  %v1102_v10 = vld [vmem:[%s1453_s1 + $0xe8] sm:$0xff]   ;;  %v140_v39 = vunpack.c.0.s8 %v139_v34 }
   0x4   :  { %v1095_v3 = vld [vmem:[%s1453_s1 + $0xb8] sm:$0xff]   ;;  %981 = vmatprep.subr.bf16.mxu1 %v1094_v2  ;;  %961 = vmatprep.subr.bf16.mxu0 %v1096_v4  ;;  %v1099_v7 = vld [vmem:[%s1453_s1 + $0xb0] sm:$0xff]   ;;  %v1103_v11 = vld [vmem:[%s1453_s1 + $0xa8] sm:$0xff]  }
   0x5   :  { %982 = vmatpush3.bf16.msra.mxu1 %v1095_v3  ;;  %v1104_v12 = vld [vmem:[%s1453_s1 + $0x60] sm:$0xff]   ;;  %v1108_v16 = vld [vmem:[%s1453_s1 + $0x58] sm:$0xff]   ;;  %v1112_v20 = vld [vmem:[%s1453_s1 + $0x50] sm:$0xff]   ;;  %v143_v41 = vsub.s32 %v140_v39, %v142_v35 }
   0x6   :  { %983 = vmatprep.subr.bf16.mxu1 %v1098_v6  ;;  %v1105_v13 = vld [vmem:[%s1453_s1 + $0x20] sm:$0xff]   ;;  %v1109_v17 = vld [vmem:[%s1453_s1 + $0x18] sm:$0xff]   ;;  %v1113_v21 = vld [vmem:[%s1453_s1 + $0x10] sm:$0xff]  }
   0x7   :  { %962 = vmatpush3.bf16.msra.mxu0 %v1097_v5  ;;  %v1106_v14 = vld [vmem:[%s1453_s1 + $0xe0] sm:$0xff]   ;;  %v1110_v18 = vld [vmem:[%s1453_s1 + $0xd8] sm:$0xff]   ;;  %v1114_v22 = vld [vmem:[%s1453_s1 + $0xd0] sm:$0xff]  }
   0x8   :  { %963 = vmatprep.subr.bf16.mxu0 %v1100_v8  ;;  %v1107_v15 = vld [vmem:[%s1453_s1 + $0xa0] sm:$0xff]   ;;  %v1111_v19 = vld [vmem:[%s1453_s1 + $0x98] sm:$0xff]   ;;  %v1115_v23 = vld [vmem:[%s1453_s1 + $0x90] sm:$0xff]  }
   0x9   :  { %984 = vmatpush3.bf16.msra.mxu1 %v1099_v7  ;;  %v1116_v24 = vld [vmem:[%s1453_s1 + $0x48] sm:$0xff]   ;;  %v1120_v28 = vld [vmem:[%s1453_s1 + $0x40] sm:$0xff]   ;;  %v1125_v37 = vld [vmem:[%s1453_s1 + $0x178] sm:$0xff]  }
   0xa   :  { %985 = vmatprep.subr.bf16.mxu1 %v1102_v10  ;;  %v1117_v25 = vld [vmem:[%s1453_s1 + $0x8] sm:$0xff]   ;;  %v1121_v30 = vld [vmem:[%s1453_s1] sm:$0xff]   ;;  %v1126_v48 = vld [vmem:[%s1453_s1 + $0x138] sm:$0xff]  }
   0xb   :  { %964 = vmatpush3.bf16.msra.mxu0 %v1101_v9  ;;  %v1118_v26 = vld [vmem:[%s1453_s1 + $0xc8] sm:$0xff]   ;;  %v1122_v31 = vld [vmem:[%s1453_s1 + $0xc0] sm:$0xff]   ;;  %v1127_v50 = vld [vmem:[%s1453_s1 + $0x170] sm:$0xff]  }
   0xc   :  { %965 = vmatprep.subr.bf16.mxu0 %v1104_v12  ;;  %v1119_v27 = vld [vmem:[%s1453_s1 + $0x88] sm:$0xff]   ;;  %v28_v32 = vld [vmem:[%s1452_s0] sm:$0x7f]  ;;  %v1128_v53 = vld [vmem:[%s1453_s1 + $0x130] sm:$0xff]  }
   0xd   :  { %986 = vmatpush3.bf16.msra.mxu1 %v1103_v11  ;;  %v1124_v36 = vld [vmem:[%s1453_s1 + $0x80] sm:$0xff]   ;;  %v137_v38 = vcombine.high %v28_v32, %v28_v32  ;;  %v144_v42 = vrot.slane %v28_v32, %v143_v41  ;;  %v1129_v54 = vld [vmem:[%s1453_s1 + $0x168] sm:$0xff]   ;;  %v1133_v62 = vld [vmem:[%s1453_s1 + $0x158] sm:$0xff]  }
   0xe   :  { %987 = vmatprep.subr.bf16.mxu1 %v1106_v14  ;;  %v1139_v55 = vld [vmem:[%s1453_s1 + $0x188] sm:$0xff]   ;;  %v1131_v58 = vld [vmem:[%s1453_s1 + $0x160] sm:$0xff]   ;;  %v1134_v63 = vld [vmem:[%s1453_s1 + $0x118] sm:$0xff]  }
   0xf   :  { %966 = vmatpush3.bf16.msra.mxu0 %v1105_v13  ;;  %v151_v43 = vrot.slane %v137_v38, %v143_v41  ;;  %v152_v44 = vcombine.high %v144_v42, %v144_v42  ;;  %v160_v45 = vrot.slane %v144_v42, %v143_v41  ;;  %v1130_v56 = vld [vmem:[%s1453_s1 + $0x128] sm:$0xff]   ;;  %v1142_v59 = vld [vmem:[%s1453_s1 + $0x180] sm:$0xff]   ;;  %v1135_v0 = vld [vmem:[%s1453_s1 + $0x150] sm:$0xff]  }
  0x10   :  { %967 = vmatprep.subr.bf16.mxu0 %v1108_v16  ;;  %v1132_v60 = vld [vmem:[%s1453_s1 + $0x120] sm:$0xff]  }
  0x11   :  { %988 = vmatpush3.bf16.msra.mxu1 %v1107_v15  ;;  %v153_v46 = vcombine.high %v151_v43, %v151_v43  ;;  %v174_v47 = vrot.slane %v152_v44, %v143_v41  ;;  %v182_v49 = vcombine.high %v160_v45, %v160_v45  ;;  %v167_v57 = vrot.slane %v151_v43, %v143_v41 }
  0x12   :  { %989 = vmatprep.subr.bf16.mxu1 %v1110_v18 }
  0x13   :  { %968 = vmatpush3.bf16.msra.mxu0 %v1109_v17  ;;  %527 = vmatprep.mubr.bf16.mxu0 %v174_v47  ;;  %v184_v51 = vcombine.high %v174_v47, %v174_v47  ;;  %v181_v52 = vrot.slane %v153_v46, %v143_v41  ;;  %v183_v61 = vcombine.high %v167_v57, %v167_v57 }
  0x14   :  { %969 = vmatprep.subr.bf16.mxu0 %v1112_v20 }
  0x15   :  { %990 = vmatpush3.bf16.msra.mxu1 %v1111_v19  ;;  %567 = vmatprep.mubr.bf16.mxu1 %v184_v51 }
  0x16   :  { %991 = vmatprep.subr.bf16.mxu1 %v1114_v22 }
  0x17   :  { %970 = vmatpush3.bf16.msra.mxu0 %v1113_v21 }
  0x18   :  { %971 = vmatprep.subr.bf16.mxu0 %v1116_v24 }
  0x19   :  { %992 = vmatpush3.bf16.msra.mxu1 %v1115_v23 }
  0x1a   :  { %993 = vmatprep.subr.bf16.mxu1 %v1118_v26 }
  0x1b   :  { %972 = vmatpush3.bf16.msra.mxu0 %v1117_v25 }
  0x1c   :  { %973 = vmatprep.subr.bf16.mxu0 %v1120_v28 }
  0x1d   :  { %994 = vmatpush3.bf16.msra.mxu1 %v1119_v27 }
  0x1e   :  { %995 = vmatprep.subr.bf16.mxu1 %v1122_v31 }
  0x1f   :  { %974 = vmatpush3.bf16.msra.mxu0 %v1121_v30 }
  0x20   :  { %1003 = vmatprep.subr.bf16.mxu0 %v1125_v37 }
  0x21   :  { %996 = vmatpush3.bf16.msra.mxu1 %v1124_v36 }
  0x22   :  { %1044 = vmatprep.subr.bf16.mxu1 %v1180_v40  ;;  %528 = vmatmul.mubr.bf16.vlgmr.msra.gmra.mxu0 %v160_v45 }
  0x23   :  { %1004 = vmatpush3.bf16.msra.mxu0 %v1126_v48  ;;  %607 = vmatprep.mubr.bf16.mxu0 %v181_v52 }
  0x24   :  { %568 = vmatmul.mubr.bf16.vlgmr.msra.gmra.mxu1 %v182_v49  ;;  %1005 = vmatprep.subr.bf16.mxu0 %v1127_v50 }
  0x25   :  { %1048 = vmatprep.mubr.msk.bf16.mxu1 %vm1181_vm0, %v1180_v40  ;;  %1045 = vmatpush3.bf16.msra.mxu1 %v1139_v55 }
  0x26   :  { %1046 = vmatprep.subr.bf16.mxu1 %v1180_v40 }
  0x27   :  { %1006 = vmatpush3.bf16.msra.mxu0 %v1128_v53 }
  0x28   :  { %1007 = vmatprep.subr.bf16.mxu0 %v1129_v54 }
  0x29   :  { %1047 = vmatpush3.bf16.msra.mxu1 %v1142_v59 }
  0x2a   :  { %1052 = vmatprep.subr.bf16.mxu1 %v1180_v40 }
  0x2b   :  { %1008 = vmatpush3.bf16.msra.mxu0 %v1130_v56 }
  0x2c   :  { %1009 = vmatprep.subr.bf16.mxu0 %v1131_v58  ;;  %1049 = vmatmul.mubr.msk.bf16.vlgmr.msra.gmra.mxu1 %vm491_vm1, %v183_v61 }
  0x2d   :  { %1068 = vmatprep.mubr.msk.bf16.mxu1 %vm1181_vm0, %v1180_v40 }
  0x2f   :  { %1010 = vmatpush3.bf16.msra.mxu0 %v1132_v60 }
  0x30   :  { %1011 = vmatprep.subr.bf16.mxu0 %v1133_v62 }
  0x31   :  { %12 = vsyncpa [#allocation3], 0  ;;  %v1136_v1 = vld [vmem:[%s1453_s1 + $0x110] sm:$0xff]   ;;  %v1137_v2 = vld [vmem:[%s1453_s1 + $0x148] sm:$0xff]   ;;  %vm728_vm2 = vcmask 1043456   ;;  %vm829_vm3 = vcmask 1041408  }
  0x32   :  { %v1138_v3 = vld [vmem:[%s1453_s1 + $0x108] sm:$0xff]   ;;  %v1140_v4 = vld [vmem:[%s1453_s1 + $0x140] sm:$0xff]   ;;  %v1143_v6 = vld [vmem:[%s1455_s3 + $0x38] ss:$0 sps:$4 sm:$0xff]   ;;  %vm724_vm4 = vcmask 982016   ;;  %vm825_vm5 = vcmask 687104  }
  0x33   :  { %1012 = vmatpush3.bf16.msra.mxu0 %v1134_v63  ;;  %v1141_v5 = vld [vmem:[%s1453_s1 + $0x100] sm:$0xff]   ;;  %v730_v7 = vsel %vm728_vm2, %v1143_v6, 0  ;;  %v1144_v8 = vld [vmem:[%s1455_s3 + $0x30] sm:$0xff]   ;;  %v1145_v9 = vld [vmem:[%s1455_s3 + $0x28] sm:$0xff]   ;;  %s1182_s15 = smov [#allocation2]   ;;  %vm873_vm6 = vcmask 9216  }
  0x34   :  { %1013 = vmatprep.subr.bf16.mxu0 %v1135_v0  ;;  %1053 = vmatpush3.bf16.msra.mxu1 %v730_v7  ;;  %v1146_v10 = vld [vmem:[%s1455_s3 + $0x20] sm:$0xff]   ;;  %v1147_v11 = vld [vmem:[%s1455_s3 + $0x18] sm:$0xff]   ;;  %v1148_v12 = vld [vmem:[%s1455_s3 + $0x10] sm:$0xff]  }
  0x35   :  { %1054 = vmatprep.subr.bf16.mxu1 %v1180_v40  ;;  %v1149_v13 = vld [vmem:[%s1455_s3 + $0x8] sm:$0xff]   ;;  %v1150_v14 = vld [vmem:[%s1455_s3] sm:$0xff]   ;;  %v1153_v18 = vld [vmem:[%s1457_s5 + $0x18] sm:$0xff]  }
  0x36   :  { %v1151_v15 = vld [vmem:[%s1457_s5 + $0x28] ss:$0 sps:$4 sm:$0x33]   ;;  %v1152_v17 = vld [vmem:[%s1457_s5 + $0x20] sm:$0xff]   ;;  %v1154_v19 = vld [vmem:[%s1457_s5 + $0x10] sm:$0xff]  }
  0x37   :  { %1014 = vmatpush3.bf16.msra.mxu0 %v1136_v1  ;;  %v831_v16 = vsel %vm829_vm3, %v1151_v15, 0  ;;  %v889_v33 = vld [vmem:[%s1454_s2] ss:$0 sm:$0xff]  ;;  %v1155_v47 = vld [vmem:[%s1457_s5 + $0x8] sm:$0xff]  }
  0x38   :  { %1015 = vmatprep.subr.bf16.mxu0 %v1137_v2  ;;  %1055 = vmatpush3.bf16.msra.mxu1 %v1144_v8  ;;  %v1156_v48 = vld [vmem:[%s1457_s5] sm:$0xff]   ;;  %s881_s5 = sshll.u32 %s1182_s15, 4  ;;  %s882_s5 = int_to_ptr.vmem [resolvable:$true] %s881_s5 }
  0x39   :  { %1056 = vmatprep.subr.bf16.mxu1 %v1180_v40  ;;  %v941_v49 = vld [vmem:[%s1456_s4] ss:$0 sm:$0xff]  ;;  %s1157_s4 = scalar_lea.vmem %s882_s5, 32  ;;  %p1162_p1 = scmp.lt.s32.totalorder %s882_s5, %s882_s5 }
  0x3a   :  { %p1158_p0 = scmp.ne.s32.totalorder %s882_s5, %s1157_s4  ;;  %p1163_p2 = scmp.lt.s32.totalorder %s1157_s4, %s1157_s4 }
  0x3b   :  { %1016 = vmatpush3.bf16.msra.mxu0 %v1138_v3 }
  0x3c   :  { %1017 = vmatprep.subr.bf16.mxu0 %v1140_v4  ;;  %1057 = vmatpush3.bf16.msra.mxu1 %v1145_v9  ;;  %p1164_p3 = por %p1163_p2, %p1162_p1 }
  0x3d   :  { %1058 = vmatprep.subr.bf16.mxu1 %v1180_v40 }
  0x3e   :  { %p1165_p4 = pnand %p1164_p3, %p1158_p0 }
  0x3f   :  { %1018 = vmatpush3.bf16.msra.mxu0 %v1141_v5 }
  0x40   :  { %1072 = vmatprep.subr.bf16.mxu0 %v1180_v40  ;;  %1059 = vmatpush3.bf16.msra.mxu1 %v1146_v10 }
  0x41   :  { %1060 = vmatprep.subr.bf16.mxu1 %v1180_v40 }
  0x42   :  { %608 = vmatmul.mubr.bf16.vlgmr.msra.gmra.mxu0 %v167_v57 }
  0x43   :  { %1084 = vmatprep.mubr.msk.bf16.mxu0 %vm1181_vm0, %v1180_v40  ;;  %1073 = vmatpush3.bf16.msra.mxu0 %v831_v16 }
  0x44   :  { %1061 = vmatpush3.bf16.msra.mxu1 %v1147_v11  ;;  %1074 = vmatprep.subr.bf16.mxu0 %v1180_v40 }
  0x45   :  { %1062 = vmatprep.subr.bf16.mxu1 %v1180_v40 }
  0x47   :  { %1075 = vmatpush3.bf16.msra.mxu0 %v1152_v17 }
  0x48   :  { %1063 = vmatpush3.bf16.msra.mxu1 %v1148_v12  ;;  %1076 = vmatprep.subr.bf16.mxu0 %v1180_v40 }
  0x49   :  { %1064 = vmatprep.subr.bf16.mxu1 %v1180_v40 }
  0x4b   :  { %1077 = vmatpush3.bf16.msra.mxu0 %v1153_v18 }
  0x4c   :  { %1065 = vmatpush3.bf16.msra.mxu1 %v1149_v13  ;;  %1078 = vmatprep.subr.bf16.mxu0 %v1180_v40 }
  0x4d   :  { %1066 = vmatprep.subr.bf16.mxu1 %v1180_v40 }
  0x4f   :  { %1079 = vmatpush3.bf16.msra.mxu0 %v1154_v19 }
  0x50   :  { %1067 = vmatpush3.bf16.msra.mxu1 %v1150_v14  ;;  %1080 = vmatprep.subr.bf16.mxu0 %v1180_v40 }
  0x53   :  { %1081 = vmatpush3.bf16.msra.mxu0 %v1155_v47 }
  0x54   :  { %1082 = vmatprep.subr.bf16.mxu0 %v1180_v40  ;;  %v951_v40 = vld [vmem:[%s1458_s6] ss:$0 sm:$0xff] }
  0x57   :  { %1083 = vmatpush3.bf16.msra.mxu0 %v1156_v48 }
  0xe2   :  { %v975_v20 = vpop.f32.mrf.mxu0 }
  0xe4   :  { %v976_v21 = vpop.f32.mrf.mxu0  ;;  %v997_v22 = vpop.f32.mrf.mxu1 }
  0xe5   :  { %v977_v32 = vadd.f32 %v976_v21, %v975_v20 }
  0xe6   :  { %v978_v23 = vpop.f32.mrf.mxu0  ;;  %v998_v24 = vpop.f32.mrf.mxu1 }
  0xe7   :  { %v530_v34 = vadd.f32 %v977_v32, %v889_v33  ;;  %v999_v35 = vadd.f32 %v998_v24, %v997_v22 }
  0xe8   :  { %v979_v25 = vpop.f32.mrf.mxu0  ;;  %v1000_v26 = vpop.f32.mrf.mxu1 }
  0xe9   :  { %v570_v38 = vadd.f32 %v999_v35, %v530_v34 }
  0xea   :  { %v1001_v27 = vpop.f32.mrf.mxu1 }
  0xec   :  { %v649_v28 = vpop.f32.mrf.mxu1 }
  0xee   :  { %v1050_v29 = vpop.f32.mrf.mxu1 }
  0xf0   :  { %v652_v30 = vpop.f32.mrf.mxu1 }
  0xf2   :  { %v1051_v31 = vpop.f32.mrf.mxu1 }
 0x102   :  { %v1019_v36 = vpop.f32.mrf.mxu0 }
 0x104   :  { %v1020_v37 = vpop.f32.mrf.mxu0 }
 0x105   :  { %v1021_v39 = vadd.f32 %v1020_v37, %v1019_v36 }
 0x106   :  { %v1022_v41 = vpop.f32.mrf.mxu0 }
 0x107   :  { %v610_v42 = vadd.f32 %v1021_v39, %v570_v38 }
 0x108   :  { %v1023_v43 = vpop.f32.mrf.mxu0 }
 0x109   :  { %v650_v44 = vadd.f32 %v649_v28, %v610_v42 }
 0x10b   :  { %v655_v45 = vmax.f32 %v650_v44, 0.0 }
 0x10d   :  { %v656_v46 = vpack.c.bf16 %v655_v45, %v655_v45 }
 0x10f   :  { %1069 = vmatmul.mubr.msk.bf16.vlgmr.msra.gmra.mxu1 %vm724_vm4, %v656_v46 }
 0x1cf   :  { %v766_v50 = vpop.f32.mrf.mxu1 }
 0x1d0   :  { %v767_v51 = vadd.f32 %v941_v49, %v766_v50 }
 0x1d1   :  { %v1070_v52 = vpop.f32.mrf.mxu1 }
 0x1d2   :  { %v772_v53 = vmax.f32 %v767_v51, 0.0 }
 0x1d3   :  { %v769_v54 = vpop.f32.mrf.mxu1 }
 0x1d4   :  { %v773_v55 = vpack.c.bf16 %v772_v53, %v772_v53 }
 0x1d5   :  { %v1071_v56 = vpop.f32.mrf.mxu1 }
 0x1d6   :  { %1085 = vmatmul.mubr.msk.bf16.vlgmr.msra.gmra.mxu0 %vm825_vm5, %v773_v55 }
 0x296   :  { %v867_v57 = vpop.f32.mrf.mxu0 }
 0x297   :  { %v868_v58 = vadd.f32 %v951_v40, %v867_v57 }
 0x298   :  { %v1086_v59 = vpop.f32.mrf.mxu0 }
 0x299   :  { %874 = vst.msk [vmem:[#allocation2] sm:$0x3] %vm873_vm6, %v868_v58 }
 0x29a   :  { %v870_v60 = vpop.f32.mrf.mxu0 }
 0x29b   :  { %1168 = shalt.err (!%p1165_p4)
}
 0x29c   :  { %884 = dma.vmem_to_hbm [thread:$0]  %s882_s5, 32, %s1459_s7, [#allocation3]   ;;  %v1087_v61 = vpop.f32.mrf.mxu0 }
 0x29d   :  { %1177 = dma.done.wait [#allocation3], 32  }
 0x29e   :  { %1178 = vsyncadd [#allocation3], 4294967264 }
 0x29f   :  { %888 = vsyncpa [#allocation3], 1 }

</bundles_post_ra>
